<compile_context>
chip_gen: v6e
topology: v6e:2x2x1
jax: 0.10.0
libtpu: 0.0.40
codegen_flags: <defaults>
</compile_context>

<pallas_src>
import jax
import jax.numpy as jnp
from jax.experimental import pallas as pl
from jax.experimental.pallas import tpu as pltpu

N_NODES = 52            # forced by kernel_size=52 in the PyTorch forward
POINT_FEATURE_DIM = 16  # GATConv in_channels
OUT_FEATURE_DIM = 32    # GATConv/Linear out_channels
NEG_SLOPE = 0.2         # GATConv default negative_slope

# --- parameter-slab row offsets (all starts multiples of 8 for aligned sublane loads) ---
_R_W0 = 0                                  # [Fin, F]  gat0 weight (pre-transposed)
_R_AD0 = 16                                # [1, F]    gat0 att_dst (as a row)
_R_AS0 = 24                                # [1, F]    gat0 att_src
_R_B0 = 32                                 # [1, F]    gat0 bias
_R_W1 = 40                                 # [F, F]    gat1 weight (pre-transposed)
_R_AD1 = 72                                # [1, F]    gat1 att_dst (as a row)
_R_AS1 = 80                                # [1, F]    gat1 att_src
_R_B1 = 88                                 # [1, F]    gat1 bias
_R_WM = 96                                 # [F, F]    mlp weight (pre-transposed)
_R_BM = 128                                # [1, F]    mlp bias
_R_BG = 136                                # [1, 1]    gcn1 bias
_PARAM_ROWS = 144


def gcab_kernel(adjp_ref, x_ref, p_ref, out_ref):
    Fin, F = POINT_FEATURE_DIM, OUT_FEATURE_DIM

    mask_bias = adjp_ref[0]       # [N, N]  0.0 on edges, -1e30 elsewhere
    gcn_adj = adjp_ref[1]         # [N, N]  wg * D^-1/2 (A+I) D^-1/2
    x = x_ref[...]                # [N, Fin]

    w0t = p_ref[_R_W0:_R_W0 + Fin, :]        # [Fin, F]
    ad0 = p_ref[_R_AD0:_R_AD0 + 1, :]        # [1, F]
    as0 = p_ref[_R_AS0:_R_AS0 + 1, :]        # [1, F]
    b0 = p_ref[_R_B0:_R_B0 + 1, :]           # [1, F]
    w1t = p_ref[_R_W1:_R_W1 + F, :]          # [F, F]
    ad1 = p_ref[_R_AD1:_R_AD1 + 1, :]        # [1, F]
    as1 = p_ref[_R_AS1:_R_AS1 + 1, :]        # [1, F]
    b1 = p_ref[_R_B1:_R_B1 + 1, :]           # [1, F]
    wmt = p_ref[_R_WM:_R_WM + F, :]          # [F, F]
    bm = p_ref[_R_BM:_R_BM + 1, :]           # [1, F]
    bg = p_ref[_R_BG:_R_BG + 1, 0:1]         # [1, 1]

    def gat(xin, wt, ad_row, as_row, bias_row):
        # GATConv, heads=1, concat=True (self loops already in the adjacency).
        xw = jnp.dot(xin, wt, preferred_element_type=jnp.float32)            # [N, F]  MXU
        # dst attention: VPU multiply + XLU lane reduce (was a [N,F]x[F,1] MXU matvec)
        a_d = jnp.sum(xw * ad_row, axis=-1, keepdims=True)                   # [N, 1]
        # src attention row: A @ B^T via dot_general (row layout needed for broadcast)
        a_s = jax.lax.dot_general(as_row, xw, (((1,), (1,)), ((), ())),
                                  preferred_element_type=jnp.float32)        # [1, N]
        e = a_d + a_s                                                        # [N, N]
        e = jnp.where(e >= 0.0, e, NEG_SLOPE * e)                            # leaky_relu
        e = e + mask_bias                                                    # mask non-edges
        e = e - jnp.max(e, axis=-1, keepdims=True)
        p = jnp.exp(e)                                                       # off-edge -> 0
        inv = pl.reciprocal(jnp.sum(p, axis=-1, keepdims=True), approx=True)  # [N, 1] EUP
        # defer softmax normalization past the aggregation matmul
        return jnp.dot(p, xw, preferred_element_type=jnp.float32) * inv + bias_row

    h0 = gat(x, w0t, ad0, as0, b0)                                           # gat0
    h1 = gat(h0, w1t, ad1, as1, b1)                                          # gat1
    h = jnp.maximum(h1 + h0, 0.0)                                            # residual + relu

    # channel attention: avg/max pool over nodes (kernel_size=52 == N) -> MLP -> sigmoid
    avg = jnp.sum(h, axis=0, keepdims=True) * (1.0 / jnp.float32(N_NODES))   # [1, F]
    mx = jnp.max(h, axis=0, keepdims=True)                                   # [1, F]
    row_id = jax.lax.broadcasted_iota(jnp.int32, (2, F), 0)
    pooled = jnp.where(row_id == 0,
                       jnp.broadcast_to(avg, (2, F)),
                       jnp.broadcast_to(mx, (2, F)))                         # [2, F]
    mlp = jnp.maximum(jnp.dot(pooled, wmt, preferred_element_type=jnp.float32) + bm, 0.0)
    mch = jax.nn.sigmoid(jnp.sum(mlp, axis=0, keepdims=True))                # [1, F]
    h = h * mch

    # node attention: max pool over features, GCNConv(1,1) (wg folded into gcn_adj), sigmoid
    h_max = jnp.max(h, axis=-1, keepdims=True)                               # [N, 1]
    gcn = jnp.dot(gcn_adj, h_max, preferred_element_type=jnp.float32) + bg   # [N, 1]
    out_ref[...] = h * jax.nn.sigmoid(gcn)                                   # [N, F]


def _pack_inputs(adj, params):
    """Build the 2 consolidated kernel inputs (adjacency pack + parameter slab)."""
    (w0t, as0, ad0, b0, w1t, as1, ad1, b1, wmt, bm, wg, bg) = params
    Fin, F = POINT_FEATURE_DIM, OUT_FEATURE_DIM

    adj = adj.astype(jnp.float32)
    mask_bias = jnp.where(adj > 0.0, 0.0, -1e30).astype(jnp.float32)
    deg_col = jnp.sum(adj, axis=1, keepdims=True)
    deg_row = jnp.sum(adj, axis=0, keepdims=True)
    norm_adj = adj * jax.lax.rsqrt(deg_col) * jax.lax.rsqrt(deg_row)         # D^-1/2 A_hat D^-1/2
    gcn_adj = norm_adj * wg[0, 0]                                            # fold (1,1) weight
    adj_pack = jnp.stack([mask_bias, gcn_adj], axis=0)                       # [2, N, N]

    slab = jnp.zeros((_PARAM_ROWS, F), jnp.float32)
    slab = slab.at[_R_W0:_R_W0 + Fin, :].set(w0t)
    slab = slab.at[_R_AD0, :].set(ad0[:, 0])
    slab = slab.at[_R_AS0, :].set(as0[0, :])
    slab = slab.at[_R_B0, :].set(b0[0, :])
    slab = slab.at[_R_W1:_R_W1 + F, :].set(w1t)
    slab = slab.at[_R_AD1, :].set(ad1[:, 0])
    slab = slab.at[_R_AS1, :].set(as1[0, :])
    slab = slab.at[_R_B1, :].set(b1[0, :])
    slab = slab.at[_R_WM:_R_WM + F, :].set(wmt)
    slab = slab.at[_R_BM, :].set(bm[0, :])
    slab = slab.at[_R_BG, 0].set(bg[0, 0])
    return adj_pack, slab


def gcab_forward(adj, x, params):
    adj_pack, slab = _pack_inputs(adj, params)
    kernel_fn = pl.pallas_call(
        gcab_kernel,
        out_shape=jax.ShapeDtypeStruct((N_NODES, OUT_FEATURE_DIM), jnp.float32),
        in_specs=[pl.BlockSpec(memory_space=pltpu.MemorySpace.VMEM) for _ in range(3)],
        out_specs=pl.BlockSpec(memory_space=pltpu.MemorySpace.VMEM),
        compiler_params=pltpu.CompilerParams(vmem_limit_bytes=4 * 1024 * 1024),
        cost_estimate=pl.CostEstimate(flops=570_000, transcendentals=5_600,
                                      bytes_accessed=50_048),
    )
    return kernel_fn(adj_pack, x.astype(jnp.float32), slab)


def gcab_ref(adj, x, params):
    # Pure-JAX reference with identical dense math (for validation only).
    (w0t, as0, ad0, b0, w1t, as1, ad1, b1, wmt, bm, wg, bg) = params

    def gat(xin, wt, a_src_row, a_dst_col, bias_row):
        xw = xin @ wt
        e = (xw @ a_dst_col) + (a_src_row @ xw.T)
        e = jnp.where(e >= 0.0, e, NEG_SLOPE * e)
        e = jnp.where(adj > 0.0, e, -1e30)
        e = e - jnp.max(e, axis=-1, keepdims=True)
        p = jnp.exp(e) * (adj > 0.0)
        p = p / jnp.sum(p, axis=-1, keepdims=True)
        return p @ xw + bias_row

    h0 = gat(x, w0t, as0, ad0, b0)
    h1 = gat(h0, w1t, as1, ad1, b1)
    h = jnp.maximum(h1 + h0, 0.0)
    avg = jnp.mean(h, axis=0, keepdims=True)
    mx = jnp.max(h, axis=0, keepdims=True)
    mch = jax.nn.sigmoid(jnp.maximum(avg @ wmt + bm, 0.0) + jnp.maximum(mx @ wmt + bm, 0.0))
    h = h * mch
    h_max = jnp.max(h, axis=-1, keepdims=True)
    d = jnp.sum(adj, axis=1, keepdims=True)
    norm_adj = adj / jnp.sqrt(d) / jnp.sqrt(d.T)
    mno = jax.nn.sigmoid(norm_adj @ (h_max * wg) + bg)
    return h * mno


if __name__ == "__main__":
    key = jax.random.PRNGKey(0)
    ks = jax.random.split(key, 16)
    N, Fin, F = N_NODES, POINT_FEATURE_DIM, OUT_FEATURE_DIM

    def init(k, shape, scale=0.2):
        return scale * jax.random.normal(k, shape, dtype=jnp.float32)

    # node features
    x = jax.random.normal(ks[0], (N, Fin), dtype=jnp.float32)

    # undirected ring graph: edge_index row0 = source, row1 = target; add self loops
    s = jnp.arange(N, dtype=jnp.int32)
    d = (s + 1) % N
    edge_index = jnp.stack([jnp.concatenate([s, d]), jnp.concatenate([d, s])])
    adj = jnp.zeros((N, N), jnp.float32).at[edge_index[1], edge_index[0]].set(1.0)
    adj = jnp.minimum(adj + jnp.eye(N, dtype=jnp.float32), 1.0)

    # deterministic synthetic parameters (shapes from GCAB.__init__)
    params = (
        init(ks[1], (Fin, F)),        # gat0 lin weight (pre-transposed: [Fin, F])
        init(ks[2], (1, F)),          # gat0 att_src
        init(ks[3], (F, 1)),          # gat0 att_dst
        init(ks[4], (1, F), 0.1),     # gat0 bias
        init(ks[5], (F, F)),          # gat1 lin weight (pre-transposed)
        init(ks[6], (1, F)),          # gat1 att_src
        init(ks[7], (F, 1)),          # gat1 att_dst
        init(ks[8], (1, F), 0.1),     # gat1 bias
        init(ks[9], (F, F)),          # mlp weight (pre-transposed)
        init(ks[10], (1, F), 0.1),    # mlp bias
        init(ks[11], (1, 1), 0.5),    # gcn1 weight
        init(ks[12], (1, 1), 0.1),    # gcn1 bias
    )

    out = jax.jit(gcab_forward)(adj, x, params)
    out = jax.block_until_ready(out)

    ref = gcab_ref(adj, x, params)
    assert out.shape == (N, F), out.shape
    assert bool(jnp.all(jnp.isfinite(out)))
    assert bool(jnp.allclose(out, ref, rtol=2e-3, atol=2e-3)), "mismatch vs reference"

    print("KERNEL_OK")
</pallas_src>

<mosaic_0001>
module attributes {stable_mosaic.version = 11 : i64} {
  func.func @gcab_kernel(%arg0: memref<2x52x52xf32, #tpu.memory_space<vmem>>, %arg1: memref<52x16xf32, #tpu.memory_space<vmem>>, %arg2: memref<144x32xf32, #tpu.memory_space<vmem>>, %arg3: memref<52x32xf32, #tpu.memory_space<vmem>>) attributes {dimension_semantics = [], scalar_prefetch = 0 : i64, scratch_operands = 0 : i64, tpu.core_type = #tpu.core_type<tc>} {
    %c0 = arith.constant 0 : index
    %c0_0 = arith.constant 0 : index
    %c0_1 = arith.constant 0 : index
    %0 = vector.load %arg0[%c0, %c0_0, %c0_1] : memref<2x52x52xf32, #tpu.memory_space<vmem>>, vector<1x52x52xf32>
    %1 = vector.shape_cast %0 : vector<1x52x52xf32> to vector<52x52xf32>
    %c1 = arith.constant 1 : index
    %c0_2 = arith.constant 0 : index
    %c0_3 = arith.constant 0 : index
    %2 = vector.load %arg0[%c1, %c0_2, %c0_3] : memref<2x52x52xf32, #tpu.memory_space<vmem>>, vector<1x52x52xf32>
    %3 = vector.shape_cast %2 : vector<1x52x52xf32> to vector<52x52xf32>
    %c0_4 = arith.constant 0 : index
    %c0_5 = arith.constant 0 : index
    %4 = vector.load %arg1[%c0_4, %c0_5] : memref<52x16xf32, #tpu.memory_space<vmem>>, vector<52x16xf32>
    %c0_6 = arith.constant 0 : index
    %c0_7 = arith.constant 0 : index
    %5 = vector.load %arg2[%c0_6, %c0_7] : memref<144x32xf32, #tpu.memory_space<vmem>>, vector<16x32xf32>
    %c16 = arith.constant 16 : index
    %c0_8 = arith.constant 0 : index
    %6 = vector.load %arg2[%c16, %c0_8] : memref<144x32xf32, #tpu.memory_space<vmem>>, vector<1x32xf32>
    %c24 = arith.constant 24 : index
    %c0_9 = arith.constant 0 : index
    %7 = vector.load %arg2[%c24, %c0_9] : memref<144x32xf32, #tpu.memory_space<vmem>>, vector<1x32xf32>
    %c32 = arith.constant 32 : index
    %c0_10 = arith.constant 0 : index
    %8 = vector.load %arg2[%c32, %c0_10] : memref<144x32xf32, #tpu.memory_space<vmem>>, vector<1x32xf32>
    %c40 = arith.constant 40 : index
    %c0_11 = arith.constant 0 : index
    %9 = vector.load %arg2[%c40, %c0_11] : memref<144x32xf32, #tpu.memory_space<vmem>>, vector<32x32xf32>
    %c72 = arith.constant 72 : index
    %c0_12 = arith.constant 0 : index
    %10 = vector.load %arg2[%c72, %c0_12] : memref<144x32xf32, #tpu.memory_space<vmem>>, vector<1x32xf32>
    %c80 = arith.constant 80 : index
    %c0_13 = arith.constant 0 : index
    %11 = vector.load %arg2[%c80, %c0_13] : memref<144x32xf32, #tpu.memory_space<vmem>>, vector<1x32xf32>
    %c88 = arith.constant 88 : index
    %c0_14 = arith.constant 0 : index
    %12 = vector.load %arg2[%c88, %c0_14] : memref<144x32xf32, #tpu.memory_space<vmem>>, vector<1x32xf32>
    %c96 = arith.constant 96 : index
    %c0_15 = arith.constant 0 : index
    %13 = vector.load %arg2[%c96, %c0_15] : memref<144x32xf32, #tpu.memory_space<vmem>>, vector<32x32xf32>
    %c128 = arith.constant 128 : index
    %c0_16 = arith.constant 0 : index
    %14 = vector.load %arg2[%c128, %c0_16] : memref<144x32xf32, #tpu.memory_space<vmem>>, vector<1x32xf32>
    %c136 = arith.constant 136 : index
    %c0_17 = arith.constant 0 : index
    %15 = vector.load %arg2[%c136, %c0_17] : memref<144x32xf32, #tpu.memory_space<vmem>>, vector<1x1xf32>
    %cst = arith.constant dense<0.000000e+00> : vector<52x32xf32>
    %16 = tpu.matmul %4, %5, %cst {dimension_numbers = #tpu.dot_dimension_numbers<[1], [0], [0], [1], [0, 0, 1, 1], [], []>} : vector<52x16xf32>, vector<16x32xf32>, vector<52x32xf32> -> vector<52x32xf32>
    %17 = vector.broadcast %6 : vector<1x32xf32> to vector<52x32xf32>
    %18 = arith.mulf %16, %17 : vector<52x32xf32>
    %cst_18 = arith.constant dense<0.000000e+00> : vector<52xf32>
    %19 = vector.multi_reduction <add>, %18, %cst_18 [1] : vector<52x32xf32> to vector<52xf32>
    %20 = vector.shape_cast %19 : vector<52xf32> to vector<52x1xf32>
    %cst_19 = arith.constant dense<0.000000e+00> : vector<1x52xf32>
    %21 = tpu.matmul %7, %16, %cst_19 {dimension_numbers = #tpu.dot_dimension_numbers<[1], [1], [0], [0], [0, 0, 1, 0], [], []>} : vector<1x32xf32>, vector<52x32xf32>, vector<1x52xf32> -> vector<1x52xf32>
    %22 = vector.broadcast %20 : vector<52x1xf32> to vector<52x52xf32>
    %23 = vector.broadcast %21 : vector<1x52xf32> to vector<52x52xf32>
    %24 = arith.addf %22, %23 : vector<52x52xf32>
    %cst_20 = arith.constant 0.000000e+00 : f32
    %25 = vector.broadcast %cst_20 : f32 to vector<52x52xf32>
    %26 = arith.cmpf oge, %24, %25 : vector<52x52xf32>
    %cst_21 = arith.constant 2.000000e-01 : f32
    %27 = vector.broadcast %cst_21 : f32 to vector<52x52xf32>
    %28 = arith.mulf %27, %24 : vector<52x52xf32>
    %29 = arith.select %26, %24, %28 : vector<52x52xi1>, vector<52x52xf32>
    %30 = arith.addf %29, %1 : vector<52x52xf32>
    %cst_22 = arith.constant dense<0xFF800000> : vector<52xf32>
    %31 = vector.multi_reduction <maximumf>, %30, %cst_22 [1] : vector<52x52xf32> to vector<52xf32>
    %32 = vector.shape_cast %31 : vector<52xf32> to vector<52x1xf32>
    %33 = vector.broadcast %32 : vector<52x1xf32> to vector<52x52xf32>
    %34 = arith.subf %30, %33 : vector<52x52xf32>
    %35 = math.exp %34 : vector<52x52xf32>
    %cst_23 = arith.constant dense<0.000000e+00> : vector<52xf32>
    %36 = vector.multi_reduction <add>, %35, %cst_23 [1] : vector<52x52xf32> to vector<52xf32>
    %37 = vector.shape_cast %36 : vector<52xf32> to vector<52x1xf32>
    %38 = tpu.reciprocal %37 {approx = true} : vector<52x1xf32> -> vector<52x1xf32>
    %cst_24 = arith.constant dense<0.000000e+00> : vector<52x32xf32>
    %39 = tpu.matmul %35, %16, %cst_24 {dimension_numbers = #tpu.dot_dimension_numbers<[1], [0], [0], [1], [0, 0, 1, 1], [], []>} : vector<52x52xf32>, vector<52x32xf32>, vector<52x32xf32> -> vector<52x32xf32>
    %40 = vector.broadcast %38 : vector<52x1xf32> to vector<52x32xf32>
    %41 = arith.mulf %39, %40 : vector<52x32xf32>
    %42 = vector.broadcast %8 : vector<1x32xf32> to vector<52x32xf32>
    %43 = arith.addf %41, %42 : vector<52x32xf32>
    %cst_25 = arith.constant dense<0.000000e+00> : vector<52x32xf32>
    %44 = tpu.matmul %43, %9, %cst_25 {dimension_numbers = #tpu.dot_dimension_numbers<[1], [0], [0], [1], [0, 0, 1, 1], [], []>} : vector<52x32xf32>, vector<32x32xf32>, vector<52x32xf32> -> vector<52x32xf32>
    %45 = vector.broadcast %10 : vector<1x32xf32> to vector<52x32xf32>
    %46 = arith.mulf %44, %45 : vector<52x32xf32>
    %cst_26 = arith.constant dense<0.000000e+00> : vector<52xf32>
    %47 = vector.multi_reduction <add>, %46, %cst_26 [1] : vector<52x32xf32> to vector<52xf32>
    %48 = vector.shape_cast %47 : vector<52xf32> to vector<52x1xf32>
    %cst_27 = arith.constant dense<0.000000e+00> : vector<1x52xf32>
    %49 = tpu.matmul %11, %44, %cst_27 {dimension_numbers = #tpu.dot_dimension_numbers<[1], [1], [0], [0], [0, 0, 1, 0], [], []>} : vector<1x32xf32>, vector<52x32xf32>, vector<1x52xf32> -> vector<1x52xf32>
    %50 = vector.broadcast %48 : vector<52x1xf32> to vector<52x52xf32>
    %51 = vector.broadcast %49 : vector<1x52xf32> to vector<52x52xf32>
    %52 = arith.addf %50, %51 : vector<52x52xf32>
    %cst_28 = arith.constant 0.000000e+00 : f32
    %53 = vector.broadcast %cst_28 : f32 to vector<52x52xf32>
    %54 = arith.cmpf oge, %52, %53 : vector<52x52xf32>
    %cst_29 = arith.constant 2.000000e-01 : f32
    %55 = vector.broadcast %cst_29 : f32 to vector<52x52xf32>
    %56 = arith.mulf %55, %52 : vector<52x52xf32>
    %57 = arith.select %54, %52, %56 : vector<52x52xi1>, vector<52x52xf32>
    %58 = arith.addf %57, %1 : vector<52x52xf32>
    %cst_30 = arith.constant dense<0xFF800000> : vector<52xf32>
    %59 = vector.multi_reduction <maximumf>, %58, %cst_30 [1] : vector<52x52xf32> to vector<52xf32>
    %60 = vector.shape_cast %59 : vector<52xf32> to vector<52x1xf32>
    %61 = vector.broadcast %60 : vector<52x1xf32> to vector<52x52xf32>
    %62 = arith.subf %58, %61 : vector<52x52xf32>
    %63 = math.exp %62 : vector<52x52xf32>
    %cst_31 = arith.constant dense<0.000000e+00> : vector<52xf32>
    %64 = vector.multi_reduction <add>, %63, %cst_31 [1] : vector<52x52xf32> to vector<52xf32>
    %65 = vector.shape_cast %64 : vector<52xf32> to vector<52x1xf32>
    %66 = tpu.reciprocal %65 {approx = true} : vector<52x1xf32> -> vector<52x1xf32>
    %cst_32 = arith.constant dense<0.000000e+00> : vector<52x32xf32>
    %67 = tpu.matmul %63, %44, %cst_32 {dimension_numbers = #tpu.dot_dimension_numbers<[1], [0], [0], [1], [0, 0, 1, 1], [], []>} : vector<52x52xf32>, vector<52x32xf32>, vector<52x32xf32> -> vector<52x32xf32>
    %68 = vector.broadcast %66 : vector<52x1xf32> to vector<52x32xf32>
    %69 = arith.mulf %67, %68 : vector<52x32xf32>
    %70 = vector.broadcast %12 : vector<1x32xf32> to vector<52x32xf32>
    %71 = arith.addf %69, %70 : vector<52x32xf32>
    %72 = arith.addf %71, %43 : vector<52x32xf32>
    %cst_33 = arith.constant 0.000000e+00 : f32
    %73 = vector.broadcast %cst_33 : f32 to vector<52x32xf32>
    %74 = arith.maximumf %72, %73 : vector<52x32xf32>
    %cst_34 = arith.constant dense<0.000000e+00> : vector<32xf32>
    %75 = vector.multi_reduction <add>, %74, %cst_34 [0] : vector<52x32xf32> to vector<32xf32>
    %76 = vector.shape_cast %75 : vector<32xf32> to vector<1x32xf32>
    %cst_35 = arith.constant 1.000000e+00 : f32
    %cst_36 = arith.constant 5.200000e+01 : f32
    %77 = arith.divf %cst_35, %cst_36 : f32
    %78 = vector.broadcast %77 : f32 to vector<1x32xf32>
    %79 = arith.mulf %76, %78 : vector<1x32xf32>
    %cst_37 = arith.constant dense<0xFF800000> : vector<32xf32>
    %80 = vector.multi_reduction <maximumf>, %74, %cst_37 [0] : vector<52x32xf32> to vector<32xf32>
    %81 = vector.shape_cast %80 : vector<32xf32> to vector<1x32xf32>
    %82 = tpu.iota {dimensions = array<i32: 0>} : vector<2x32xi32>
    %c0_i32 = arith.constant 0 : i32
    %83 = vector.broadcast %c0_i32 : i32 to vector<2x32xi32>
    %84 = arith.cmpi eq, %82, %83 : vector<2x32xi32>
    %85 = vector.shape_cast %79 : vector<1x32xf32> to vector<1x32xf32>
    %86 = vector.broadcast %85 : vector<1x32xf32> to vector<2x32xf32>
    %87 = vector.shape_cast %81 : vector<1x32xf32> to vector<1x32xf32>
    %88 = vector.broadcast %87 : vector<1x32xf32> to vector<2x32xf32>
    %89 = arith.select %84, %86, %88 : vector<2x32xi1>, vector<2x32xf32>
    %cst_38 = arith.constant dense<0.000000e+00> : vector<2x32xf32>
    %90 = tpu.matmul %89, %13, %cst_38 {dimension_numbers = #tpu.dot_dimension_numbers<[1], [0], [0], [1], [0, 0, 1, 1], [], []>} : vector<2x32xf32>, vector<32x32xf32>, vector<2x32xf32> -> vector<2x32xf32>
    %91 = vector.broadcast %14 : vector<1x32xf32> to vector<2x32xf32>
    %92 = arith.addf %90, %91 : vector<2x32xf32>
    %cst_39 = arith.constant 0.000000e+00 : f32
    %93 = vector.broadcast %cst_39 : f32 to vector<2x32xf32>
    %94 = arith.maximumf %92, %93 : vector<2x32xf32>
    %cst_40 = arith.constant dense<0.000000e+00> : vector<32xf32>
    %95 = vector.multi_reduction <add>, %94, %cst_40 [0] : vector<2x32xf32> to vector<32xf32>
    %96 = vector.shape_cast %95 : vector<32xf32> to vector<1x32xf32>
    %97 = arith.negf %96 : vector<1x32xf32>
    %98 = math.exp %97 : vector<1x32xf32>
    %cst_41 = arith.constant 1.000000e+00 : f32
    %99 = vector.broadcast %cst_41 : f32 to vector<1x32xf32>
    %100 = arith.addf %99, %98 : vector<1x32xf32>
    %101 = arith.divf %99, %100 : vector<1x32xf32>
    %102 = vector.broadcast %101 : vector<1x32xf32> to vector<52x32xf32>
    %103 = arith.mulf %74, %102 : vector<52x32xf32>
    %cst_42 = arith.constant dense<0xFF800000> : vector<52xf32>
    %104 = vector.multi_reduction <maximumf>, %103, %cst_42 [1] : vector<52x32xf32> to vector<52xf32>
    %105 = vector.shape_cast %104 : vector<52xf32> to vector<52x1xf32>
    %cst_43 = arith.constant dense<0.000000e+00> : vector<52x1xf32>
    %106 = tpu.matmul %3, %105, %cst_43 {dimension_numbers = #tpu.dot_dimension_numbers<[1], [0], [0], [1], [0, 0, 1, 1], [], []>} : vector<52x52xf32>, vector<52x1xf32>, vector<52x1xf32> -> vector<52x1xf32>
    %107 = vector.broadcast %15 : vector<1x1xf32> to vector<52x1xf32>
    %108 = arith.addf %106, %107 : vector<52x1xf32>
    %109 = arith.negf %108 : vector<52x1xf32>
    %110 = math.exp %109 : vector<52x1xf32>
    %cst_44 = arith.constant 1.000000e+00 : f32
    %111 = vector.broadcast %cst_44 : f32 to vector<52x1xf32>
    %112 = arith.addf %111, %110 : vector<52x1xf32>
    %113 = arith.divf %111, %112 : vector<52x1xf32>
    %114 = vector.broadcast %113 : vector<52x1xf32> to vector<52x32xf32>
    %115 = arith.mulf %103, %114 : vector<52x32xf32>
    %c0_45 = arith.constant 0 : index
    %c0_46 = arith.constant 0 : index
    %116 = vector.load %arg3[%c0_45, %c0_46] : memref<52x32xf32, #tpu.memory_space<vmem>>, vector<52x32xf32>
    tpu.vector_store %arg3[%c0_45, %c0_46], %115 {strides = array<i32>} : memref<52x32xf32, #tpu.memory_space<vmem>>, vector<52x32xf32>,
    return
  }
}

</mosaic_0001>

<bundles_post_ra>
// kernel: gcab_forward.1
= control target key start
LH: loop header
LB: loop body
LE: loop exit
PB: predicated region body
PF: predicated region fallthrough
CT: control target
= control target key end

     0   :  { %v1910_v0 = vmov 0.0   ;;  %vm1911_vm0 = vmmov 0   ;;  %vm54_vm1 = vcmask 130048   ;;  %vm187_vm2 = vcmask 261120   ;;  %s2439_s2 = inlined_call_operand.vmem [shape: f32[144,32], index: 2, kind: input, shape index: {}]   ;;  %s2440_s1 = inlined_call_operand.vmem [shape: f32[52,16], index: 1, kind: input, shape index: {}]   ;;  %s2441_s0 = inlined_call_operand.vmem [shape: f32[2,52,52], index: 0, kind: input, shape index: {}]   ;;  %s2442_s3 = inlined_call_operand.vmem [shape: f32[52,32], index: 3, kind: output, shape index: {}]  }
   0x1   :  { %1613 = vmatprep.subr.mxu1 %v1910_v0  ;;  %v37_v1 = vld [vmem:[%s2439_s2 + $0x8] sm:$0xff]  ;;  %v36_v2 = vld [vmem:[%s2439_s2] sm:$0xff]  ;;  %1617 = vmatprep.mubr.msk.f32.mxu1 %vm1911_vm0, %v1910_v0  ;;  %v31_v5 = vld [vmem:[%s2440_s1 + $0x10] sm:$0xff]  ;;  %vm436_vm3 = vcmask 1043456   ;;  %vm206_vm4 = vcmask 257024   ;;  %v304_v41 = vlaneseq  ;;  %vm343_vm5 = vcmask 424960  }
   0x2   :  { %1614 = vmatpush3.msra.mxu1 %v37_v1  ;;  %v29_v3 = vld [vmem:[%s2440_s1] sm:$0xff]  ;;  %1655 = vmatprep.subr.mxu0 %v1910_v0  ;;  %v30_v4 = vld [vmem:[%s2440_s1 + $0x8] sm:$0xff]  ;;  %v32_v6 = vld [vmem:[%s2440_s1 + $0x18] sm:$0xff]  ;;  %vm362_vm13 = vcmask 420864  }
   0x3   :  { %1615 = vmatprep.subr.mxu1 %v1910_v0  ;;  %1669 = vmatprep.mubr.msk.f32.mxu0 %vm1911_vm0, %v1910_v0  ;;  %v33_v7 = vld [vmem:[%s2440_s1 + $0x20] sm:$0xff]  ;;  %v34_v8 = vld [vmem:[%s2440_s1 + $0x28] sm:$0xff]  ;;  %v35_v9 = vld [vmem:[%s2440_s1 + $0x30] sm:$0xf]  ;;  %v2032_v43 = vshrl.u32 %v304_v41, 7 }
   0x4   :  { %1616 = vmatpush3.msra.mxu1 %v36_v2  ;;  %v1468_v10 = vld [vmem:[%s2439_s2 + $0x10] ss:$0 sm:$0xff]  ;;  %v39_v39 = vld [vmem:[%s2439_s2 + $0x18] sm:$0x1]  ;;  %v2040_v57 = vld [vmem:[%s2441_s0 + $0x8] sm:$0xff] }
   0x5   :  { %1618 = vmatmul.mubr.msk.f32.vlgmr.msra.gmra.mxu1 %vm54_vm1, %v29_v3  ;;  %1638 = vmatprep.subr.mxu1 %v1910_v0  ;;  %v306_v45 = vsub.s32 0, %v2032_v43  ;;  %v2045_v58 = vld [vmem:[%s2441_s0] sm:$0xff]  ;;  %v2050_v59 = vld [vmem:[%s2441_s0 + $0x18] sm:$0xff] }
   0x6   :  { %1620 = vmatprep.mubr.msk.f32.mxu1 %vm1911_vm0, %v1910_v0 }
   0x9   :  { %1621 = vmatmul.mubr.msk.f32.gmra.mxu1 %vm54_vm1, %v30_v4 }
   0xa   :  { %1623 = vmatprep.mubr.msk.f32.mxu1 %vm1911_vm0, %v1910_v0 }
   0xd   :  { %1624 = vmatmul.mubr.msk.f32.gmra.mxu1 %vm54_vm1, %v31_v5 }
   0xe   :  { %1626 = vmatprep.mubr.msk.f32.mxu1 %vm1911_vm0, %v1910_v0 }
  0x11   :  { %1627 = vmatmul.mubr.msk.f32.gmra.mxu1 %vm54_vm1, %v32_v6  ;;  %v2055_v6 = vld [vmem:[%s2441_s0 + $0x10] sm:$0xff] }
  0x12   :  { %1629 = vmatprep.mubr.msk.f32.mxu1 %vm1911_vm0, %v1910_v0 }
  0x15   :  { %1630 = vmatmul.mubr.msk.f32.gmra.mxu1 %vm54_vm1, %v33_v7 }
  0x16   :  { %1632 = vmatprep.mubr.msk.f32.mxu1 %vm1911_vm0, %v1910_v0 }
  0x19   :  { %1633 = vmatmul.mubr.msk.f32.gmra.mxu1 %vm54_vm1, %v34_v8 }
  0x1a   :  { %1635 = vmatprep.mubr.msk.f32.mxu1 %vm1911_vm0, %v1910_v0 }
  0x1d   :  { %1636 = vmatmul.mubr.msk.f32.gmra.mxu1 %vm54_vm1, %v35_v9 }
  0x1e   :  { %1652 = vmatprep.mubr.msk.f32.mxu1 %vm1911_vm0, %v1910_v0 }
  0xc5   :  { %v1992_v11 = vpop.f32.mrf.mxu1 }
  0xc6   :  { %v180_v12 = vmul.f32 %v1468_v10, %v1992_v11 }
  0xc7   :  { %v1619_v13 = vpop.f32.mrf.mxu1 }
  0xc8   :  { %v188_v14 = vsel %vm187_vm2, %v180_v12, 0.0 }
  0xc9   :  { %189 = vadd.xlane.f32.xlu0 %v188_v14  ;;  %v147_v15 = vpop.f32.mrf.mxu1 }
  0xca   :  { %v181_v16 = vmul.f32 %v1468_v10, %v147_v15 }
  0xcb   :  { %v1622_v17 = vpop.f32.mrf.mxu1 }
  0xcc   :  { %v191_v18 = vsel %vm187_vm2, %v181_v16, 0.0  ;;  %v2066_v17 = vld [vmem:[%s2441_s0 + $0x28] sm:$0xff] }
  0xcd   :  { %192 = vadd.xlane.f32.xlu0 %v191_v18  ;;  %v152_v19 = vpop.f32.mrf.mxu1 }
  0xce   :  { %v182_v20 = vmul.f32 %v1468_v10, %v152_v19 }
  0xcf   :  { %v1625_v21 = vpop.f32.mrf.mxu1 }
  0xd0   :  { %v194_v22 = vsel %vm187_vm2, %v182_v20, 0.0 }
  0xd1   :  { %195 = vadd.xlane.f32.xlu1 %v194_v22  ;;  %v157_v23 = vpop.f32.mrf.mxu1 }
  0xd2   :  { %v183_v24 = vmul.f32 %v1468_v10, %v157_v23 }
  0xd3   :  { %v1628_v25 = vpop.f32.mrf.mxu1 }
  0xd4   :  { %v197_v26 = vsel %vm187_vm2, %v183_v24, 0.0 }
  0xd5   :  { %198 = vadd.xlane.f32.xlu1 %v197_v26  ;;  %v162_v27 = vpop.f32.mrf.mxu1  ;;  %v2080_v26 = vld [vmem:[%s2441_s0 + $0x30] sm:$0xf] }
  0xd6   :  { %v184_v28 = vmul.f32 %v1468_v10, %v162_v27 }
  0xd7   :  { %v1631_v29 = vpop.f32.mrf.mxu1 }
  0xd8   :  { %v200_v30 = vsel %vm187_vm2, %v184_v28, 0.0 }
  0xd9   :  { %201 = vadd.xlane.f32.xlu0 %v200_v30  ;;  %v167_v31 = vpop.f32.mrf.mxu1 }
  0xda   :  { %v185_v32 = vmul.f32 %v1468_v10, %v167_v31 }
  0xdb   :  { %v1634_v33 = vpop.f32.mrf.mxu1 }
  0xdc   :  { %v203_v34 = vsel %vm187_vm2, %v185_v32, 0.0 }
  0xdd   :  { %204 = vadd.xlane.f32.xlu1 %v203_v34  ;;  %v172_v35 = vpop.f32.mrf.mxu1 }
  0xde   :  { %1639 = vmatpush3.xpose.msk.msra.mxu1 %vm187_vm2, %v172_v35  ;;  %1656 = vmatpush3.msk.msra.mxu0 %vm436_vm3, %v172_v35  ;;  %v186_v36 = vmul.f32 %v1468_v10, %v172_v35 }
  0xdf   :  { %v1637_v37 = vpop.f32.mrf.mxu1  ;;  %1657 = vmatprep.subr.mxu0 %v1910_v0  ;;  %1640 = vmatprep.subr.mxu1 %v1910_v0 }
  0xe0   :  { %1658 = vmatpush3.msra.mxu0 %v167_v31  ;;  %v207_v38 = vsel %vm206_vm4, %v186_v36, 0.0 }
  0xe1   :  { %1659 = vmatprep.subr.mxu0 %v1910_v0  ;;  %208 = vadd.xlane.f32.xlu0 %v207_v38 }
  0xe2   :  { %1641 = vmatpush3.xpose.msk.msra.mxu1 %vm187_vm2, %v167_v31  ;;  %1660 = vmatpush3.msra.mxu0 %v162_v27 }
  0xe3   :  { %1661 = vmatprep.subr.mxu0 %v1910_v0  ;;  %1642 = vmatprep.subr.mxu1 %v1910_v0 }
  0xe4   :  { %1662 = vmatpush3.msra.mxu0 %v157_v23 }
  0xe5   :  { %1663 = vmatprep.subr.mxu0 %v1910_v0 }
  0xe6   :  { %1643 = vmatpush3.xpose.msk.msra.mxu1 %vm187_vm2, %v162_v27  ;;  %1664 = vmatpush3.msra.mxu0 %v152_v19 }
  0xe7   :  { %1665 = vmatprep.subr.mxu0 %v1910_v0  ;;  %1644 = vmatprep.subr.mxu1 %v1910_v0 }
  0xe8   :  { %1666 = vmatpush3.msra.mxu0 %v147_v15 }
  0xe9   :  { %1667 = vmatprep.subr.mxu0 %v1910_v0 }
  0xea   :  { %1645 = vmatpush3.xpose.msk.msra.mxu1 %vm187_vm2, %v157_v23  ;;  %1668 = vmatpush3.msra.mxu0 %v1992_v11 }
  0xeb   :  { %1646 = vmatprep.subr.mxu1 %v1910_v0  ;;  %1719 = vmatprep.subr.mxu0 %v1910_v0 }
  0xee   :  { %1647 = vmatpush3.xpose.msk.msra.mxu1 %vm187_vm2, %v152_v19  ;;  %v2071_v19 = vld [vmem:[%s2441_s0 + $0x20] sm:$0xff] }
  0xef   :  { %1648 = vmatprep.subr.mxu1 %v1910_v0 }
  0xf2   :  { %1649 = vmatpush3.xpose.msk.msra.mxu1 %vm187_vm2, %v147_v15 }
  0xf3   :  { %1650 = vmatprep.subr.mxu1 %v1910_v0 }
  0xf6   :  { %1651 = vmatpush3.xpose.msk.msra.mxu1 %vm187_vm2, %v1992_v11 }
  0xf7   :  { %1690 = vmatprep.subr.mxu1 %v1910_v0 }
  0xf9   :  { %1653 = vmatmul.mubr.msk.f32.vlgmr.msra.gmra.mxu1 %vm187_vm2, %v39_v39 }
  0xfa   :  { %1698 = vmatprep.mubr.msk.f32.mxu1 %vm1911_vm0, %v1910_v0 }
 0x152   :  { %v190_v40 = vpop.xlane.xlu0 %189 }
 0x156   :  { %v193_v44 = vpop.xlane.xlu0 %192 }
 0x15a   :  { %v196_v42 = vpop.xlane.xlu1 %195 }
 0x15e   :  { %v199_v46 = vpop.xlane.xlu1 %198 }
 0x162   :  { %v202_v47 = vpop.xlane.xlu0 %201 }
 0x166   :  { %v205_v51 = vpop.xlane.xlu1 %204 }
 0x16a   :  { %v209_v52 = vpop.xlane.xlu0 %208 }
 0x1b9   :  { %v300_v48 = vpop.f32.mrf.mxu1 }
 0x1ba   :  { %v307_v49 = vrot.slane %v300_v48, %v306_v45 }
 0x1bb   :  { %v1654_v50 = vpop.f32.mrf.mxu1 }
 0x1bc   :  { %v309_v53 = vadd.f32 %v307_v49, %v193_v44  ;;  %v308_v54 = vadd.f32 %v307_v49, %v190_v40  ;;  %v311_v55 = vadd.f32 %v307_v49, %v199_v46  ;;  %v310_v56 = vadd.f32 %v307_v49, %v196_v42 }
 0x1bd   :  { %v313_v60 = vadd.f32 %v307_v49, %v205_v51  ;;  %v312_v61 = vadd.f32 %v307_v49, %v202_v47  ;;  %v314_v62 = vadd.f32 %v307_v49, %v209_v52 }
 0x1be   :  { %vm316_vm6 = vcmp.ge.f32.partialorder %v309_v53, 0.0  ;;  %v323_v63 = vmul.f32 0.2, %v309_v53  ;;  %vm315_vm7 = vcmp.ge.f32.partialorder %v308_v54, 0.0  ;;  %v322_v1 = vmul.f32 0.2, %v308_v54 }
 0x1bf   :  { %vm318_vm8 = vcmp.ge.f32.partialorder %v311_v55, 0.0  ;;  %v325_v2 = vmul.f32 0.2, %v311_v55  ;;  %vm317_vm9 = vcmp.ge.f32.partialorder %v310_v56, 0.0  ;;  %v324_v3 = vmul.f32 0.2, %v310_v56 }
 0x1c0   :  { %v330_v4 = vsel %vm316_vm6, %v309_v53, %v323_v63  ;;  %v329_v5 = vsel %vm315_vm7, %v308_v54, %v322_v1  ;;  %vm320_vm10 = vcmp.ge.f32.partialorder %v313_v60, 0.0  ;;  %v327_v7 = vmul.f32 0.2, %v313_v60 }
 0x1c1   :  { %v337_v8 = vadd.f32 %v330_v4, %v2040_v57  ;;  %v336_v9 = vadd.f32 %v329_v5, %v2045_v58  ;;  %v332_v10 = vsel %vm318_vm8, %v311_v55, %v325_v2  ;;  %v331_v11 = vsel %vm317_vm9, %v310_v56, %v324_v3 }
 0x1c2   :  { %v339_v12 = vadd.f32 %v332_v10, %v2050_v59  ;;  %vm319_vm11 = vcmp.ge.f32.partialorder %v312_v61, 0.0  ;;  %v338_v15 = vadd.f32 %v331_v11, %v2055_v6  ;;  %v326_v16 = vmul.f32 0.2, %v312_v61  ;;  %v44_v10 = vld [vmem:[%s2439_s2 + $0x40] sm:$0xff]  ;;  %v43_v11 = vld [vmem:[%s2439_s2 + $0x38] sm:$0xff] }
 0x1c3   :  { %v347_v13 = vsel %vm343_vm5, %v337_v8, -inf  ;;  %v344_v14 = vsel %vm343_vm5, %v336_v9, -inf  ;;  %v334_v18 = vsel %vm320_vm10, %v313_v60, %v327_v7  ;;  %v328_v20 = vmul.f32 0.2, %v314_v62  ;;  %1691 = vmatpush3.msra.mxu1 %v44_v10 }
 0x1c4   :  { %348 = vmax.xlane.f32.xlu0 %v347_v13  ;;  %345 = vmax.xlane.f32.xlu1 %v344_v14  ;;  %v333_v21 = vsel %vm319_vm11, %v312_v61, %v326_v16  ;;  %vm321_vm12 = vcmp.ge.f32.partialorder %v314_v62, 0.0  ;;  %v353_v22 = vsel %vm343_vm5, %v339_v12, -inf  ;;  %v350_v23 = vsel %vm343_vm5, %v338_v15, -inf  ;;  %v41_v13 = vld [vmem:[%s2439_s2 + $0x28] sm:$0xff] }
 0x1c5   :  { %v341_v24 = vadd.f32 %v334_v18, %v2066_v17  ;;  %v340_v25 = vadd.f32 %v333_v21, %v2071_v19  ;;  %v335_v27 = vsel %vm321_vm12, %v314_v62, %v328_v20  ;;  %1692 = vmatprep.subr.mxu1 %v1910_v0  ;;  %vm1109_vm10 = vcmp.eq.s32.totalorder %v2032_v43, 0 }
 0x1c6   :  { %v342_v30 = vadd.f32 %v335_v27, %v2080_v26  ;;  %1693 = vmatpush3.msra.mxu1 %v43_v11  ;;  %vm1189_vm11 = vcmask 254976  }
 0x1c7   :  { %v359_v28 = vsel %vm343_vm5, %v341_v24, -inf  ;;  %v356_v29 = vsel %vm343_vm5, %v340_v25, -inf  ;;  %1694 = vmatprep.subr.mxu1 %v1910_v0 }
 0x1c8   :  { %354 = vmax.xlane.f32.xlu0 %v353_v22  ;;  %351 = vmax.xlane.f32.xlu1 %v350_v23  ;;  %v363_v31 = vsel %vm362_vm13, %v342_v30, -inf  ;;  %v1485_v22 = vld [vmem:[%s2439_s2 + $0x20] ss:$0 sm:$0xff] }
 0x1cc   :  { %360 = vmax.xlane.f32.xlu0 %v359_v28  ;;  %357 = vmax.xlane.f32.xlu1 %v356_v29 }
 0x1d0   :  { %364 = vmax.xlane.f32.xlu1 %v363_v31 }
 0x24d   :  { %v349_v32 = vpop.xlane.xlu0 %348  ;;  %v346_v33 = vpop.xlane.xlu1 %345 }
 0x24e   :  { %v367_v34 = vsub.f32 %v337_v8, %v349_v32  ;;  %v366_v35 = vsub.f32 %v336_v9, %v346_v33 }
 0x250   :  { %v375_v36 = vmul.f32 1.442695, %v367_v34  ;;  %v373_v37 = vmul.f32 1.442695, %v366_v35 }
 0x251   :  { %v355_v38 = vpop.xlane.xlu0 %354  ;;  %v352_v39 = vpop.xlane.xlu1 %351 }
 0x252   :  { %1822 = vpow2.f32 %v375_v36  ;;  %v369_v40 = vsub.f32 %v339_v12, %v355_v38  ;;  %v368_v41 = vsub.f32 %v338_v15, %v352_v39  ;;  %v42_v12 = vld [vmem:[%s2439_s2 + $0x30] sm:$0xff] }
 0x253   :  { %1824 = vpow2.f32 %v373_v37  ;;  %1695 = vmatpush3.msra.mxu1 %v42_v12 }
 0x254   :  { %v379_v42 = vmul.f32 1.442695, %v369_v40  ;;  %v377_v44 = vmul.f32 1.442695, %v368_v41  ;;  %1696 = vmatprep.subr.mxu1 %v1910_v0 }
 0x255   :  { %v361_v46 = vpop.xlane.xlu0 %360  ;;  %v358_v47 = vpop.xlane.xlu1 %357  ;;  %1697 = vmatpush3.msra.mxu1 %v41_v13 }
 0x256   :  { %1826 = vpow2.f32 %v379_v42  ;;  %v371_v48 = vsub.f32 %v341_v24, %v361_v46  ;;  %v370_v49 = vsub.f32 %v340_v25, %v358_v47  ;;  %1736 = vmatprep.subr.mxu1 %v1910_v0 }
 0x257   :  { %1828 = vpow2.f32 %v377_v44 }
 0x258   :  { %v383_v50 = vmul.f32 1.442695, %v371_v48  ;;  %v381_v51 = vmul.f32 1.442695, %v370_v49 }
 0x259   :  { %v365_v52 = vpop.xlane.xlu1 %364 }
 0x25a   :  { %1830 = vpow2.f32 %v383_v50  ;;  %v372_v53 = vsub.f32 %v342_v30, %v365_v52 }
 0x25b   :  { %1832 = vpow2.f32 %v381_v51 }
 0x25c   :  { %v385_v54 = vmul.f32 1.442695, %v372_v53 }
 0x25e   :  { %1834 = vpow2.f32 %v385_v54 }
 0x25f   :  { %v1823_v55 = vpop.eup %1822 }
 0x260   :  { %v1825_v56 = vpop.eup %1824  ;;  %v390_v60 = vsel %vm343_vm5, %v1823_v55, 0.0 }
 0x261   :  { %1670 = vmatmul.mubr.msk.f32.vlgmr.msra.gmra.mxu0 %vm343_vm5, %v1825_v56  ;;  %391 = vadd.xlane.f32.xlu1 %v390_v60  ;;  %v387_v61 = vsel %vm343_vm5, %v1825_v56, 0.0 }
 0x262   :  { %388 = vadd.xlane.f32.xlu0 %v387_v61  ;;  %1672 = vmatprep.mubr.msk.f32.mxu0 %vm1911_vm0, %v1910_v0 }
 0x263   :  { %v1827_v62 = vpop.eup %1826 }
 0x264   :  { %v1829_v63 = vpop.eup %1828  ;;  %v396_v1 = vsel %vm343_vm5, %v1827_v62, 0.0 }
 0x265   :  { %1673 = vmatmul.mubr.msk.f32.gmra.mxu0 %vm343_vm5, %v1823_v55  ;;  %397 = vadd.xlane.f32.xlu1 %v396_v1  ;;  %v393_v2 = vsel %vm343_vm5, %v1829_v63, 0.0 }
 0x266   :  { %394 = vadd.xlane.f32.xlu0 %v393_v2  ;;  %1675 = vmatprep.mubr.msk.f32.mxu0 %vm1911_vm0, %v1910_v0  ;;  %v1493_v2 = vld [vmem:[%s2439_s2 + $0x48] ss:$0 sm:$0xff] }
 0x267   :  { %v1831_v3 = vpop.eup %1830 }
 0x268   :  { %v1833_v4 = vpop.eup %1832  ;;  %v402_v5 = vsel %vm343_vm5, %v1831_v3, 0.0 }
 0x269   :  { %1676 = vmatmul.mubr.msk.f32.gmra.mxu0 %vm343_vm5, %v1829_v63  ;;  %403 = vadd.xlane.f32.xlu1 %v402_v5  ;;  %v399_v7 = vsel %vm343_vm5, %v1833_v4, 0.0 }
 0x26a   :  { %400 = vadd.xlane.f32.xlu0 %v399_v7  ;;  %1678 = vmatprep.mubr.msk.f32.mxu0 %vm1911_vm0, %v1910_v0 }
 0x26b   :  { %v1835_v8 = vpop.eup %1834 }
 0x26c   :  { %v405_v9 = vsel %vm362_vm13, %v1835_v8, 0.0 }
 0x26d   :  { %1679 = vmatmul.mubr.msk.f32.gmra.mxu0 %vm343_vm5, %v1827_v62 }
 0x26e   :  { %406 = vadd.xlane.f32.xlu0 %v405_v9  ;;  %1681 = vmatprep.mubr.msk.f32.mxu0 %vm1911_vm0, %v1910_v0 }
 0x271   :  { %1682 = vmatmul.mubr.msk.f32.gmra.mxu0 %vm343_vm5, %v1833_v4 }
 0x272   :  { %1684 = vmatprep.mubr.msk.f32.mxu0 %vm1911_vm0, %v1910_v0 }
 0x275   :  { %1685 = vmatmul.mubr.msk.f32.gmra.mxu0 %vm343_vm5, %v1831_v3 }
 0x276   :  { %1687 = vmatprep.mubr.msk.f32.mxu0 %vm1911_vm0, %v1910_v0 }
 0x279   :  { %1688 = vmatmul.mubr.msk.f32.gmra.mxu0 %vm343_vm5, %v1835_v8 }
 0x27a   :  { %1733 = vmatprep.mubr.msk.f32.mxu0 %vm1911_vm0, %v1910_v0 }
 0x2ea   :  { %v392_v15 = vpop.xlane.xlu1 %391 }
 0x2eb   :  { %v389_v14 = vpop.xlane.xlu0 %388 }
 0x2ec   :  { %1836 = vrcp.f32 %v389_v14 }
 0x2ed   :  { %1838 = vrcp.f32 %v392_v15 }
 0x2ee   :  { %v398_v18 = vpop.xlane.xlu1 %397 }
 0x2ef   :  { %v395_v16 = vpop.xlane.xlu0 %394 }
 0x2f0   :  { %1840 = vrcp.f32 %v395_v16 }
 0x2f1   :  { %1842 = vrcp.f32 %v398_v18 }
 0x2f2   :  { %v404_v29 = vpop.xlane.xlu1 %403 }
 0x2f3   :  { %v401_v21 = vpop.xlane.xlu0 %400 }
 0x2f4   :  { %1844 = vrcp.f32 %v401_v21 }
 0x2f5   :  { %1846 = vrcp.f32 %v404_v29 }
 0x2f7   :  { %v407_v35 = vpop.xlane.xlu0 %406 }
 0x2f8   :  { %1848 = vrcp.f32 %v407_v35 }
 0x2f9   :  { %v1837_v20 = vpop.eup %1836 }
 0x2fa   :  { %v1839_v28 = vpop.eup %1838 }
 0x2fd   :  { %v1841_v34 = vpop.eup %1840 }
 0x2fe   :  { %v1843_v40 = vpop.eup %1842 }
 0x301   :  { %v1845_v47 = vpop.eup %1844 }
 0x302   :  { %v1847_v52 = vpop.eup %1846 }
 0x305   :  { %v1849_v60 = vpop.eup %1848 }
 0x321   :  { %v505_v23 = vpop.f32.mrf.mxu0 }
 0x322   :  { %v539_v24 = vmul.f32 %v1837_v20, %v505_v23 }
 0x323   :  { %v1671_v25 = vpop.f32.mrf.mxu0 }
 0x324   :  { %v2133_v27 = vadd.f32 %v1485_v22, %v539_v24 }
 0x325   :  { %v510_v30 = vpop.f32.mrf.mxu0 }
 0x326   :  { %v540_v31 = vmul.f32 %v1839_v28, %v510_v30  ;;  %1699 = vmatmul.mubr.msk.f32.vlgmr.msra.gmra.mxu1 %vm187_vm2, %v2133_v27 }
 0x327   :  { %v1674_v32 = vpop.f32.mrf.mxu0  ;;  %1701 = vmatprep.mubr.msk.f32.mxu1 %vm1911_vm0, %v1910_v0 }
 0x328   :  { %v2139_v33 = vadd.f32 %v1485_v22, %v540_v31 }
 0x329   :  { %v515_v36 = vpop.f32.mrf.mxu0 }
 0x32a   :  { %v541_v37 = vmul.f32 %v1841_v34, %v515_v36  ;;  %1702 = vmatmul.mubr.msk.f32.gmra.mxu1 %vm187_vm2, %v2139_v33 }
 0x32b   :  { %v1677_v38 = vpop.f32.mrf.mxu0  ;;  %1704 = vmatprep.mubr.msk.f32.mxu1 %vm1911_vm0, %v1910_v0 }
 0x32c   :  { %v2145_v39 = vadd.f32 %v1485_v22, %v541_v37  ;;  %v46_v37 = vld [vmem:[%s2439_s2 + $0x50] sm:$0x1] }
 0x32d   :  { %v520_v41 = vpop.f32.mrf.mxu0 }
 0x32e   :  { %v542_v42 = vmul.f32 %v1843_v40, %v520_v41  ;;  %1705 = vmatmul.mubr.msk.f32.gmra.mxu1 %vm187_vm2, %v2145_v39 }
 0x32f   :  { %v1680_v44 = vpop.f32.mrf.mxu0  ;;  %1707 = vmatprep.mubr.msk.f32.mxu1 %vm1911_vm0, %v1910_v0 }
 0x330   :  { %v2151_v46 = vadd.f32 %v1485_v22, %v542_v42 }
 0x331   :  { %v525_v48 = vpop.f32.mrf.mxu0 }
 0x332   :  { %v543_v49 = vmul.f32 %v1845_v47, %v525_v48  ;;  %1708 = vmatmul.mubr.msk.f32.gmra.mxu1 %vm187_vm2, %v2151_v46 }
 0x333   :  { %v1683_v50 = vpop.f32.mrf.mxu0  ;;  %1710 = vmatprep.mubr.msk.f32.mxu1 %vm1911_vm0, %v1910_v0 }
 0x334   :  { %v2157_v51 = vadd.f32 %v1485_v22, %v543_v49 }
 0x335   :  { %v530_v53 = vpop.f32.mrf.mxu0 }
 0x336   :  { %v544_v54 = vmul.f32 %v1847_v52, %v530_v53  ;;  %1711 = vmatmul.mubr.msk.f32.gmra.mxu1 %vm187_vm2, %v2157_v51 }
 0x337   :  { %v1686_v55 = vpop.f32.mrf.mxu0  ;;  %1713 = vmatprep.mubr.msk.f32.mxu1 %vm1911_vm0, %v1910_v0 }
 0x338   :  { %v2163_v56 = vadd.f32 %v1485_v22, %v544_v54 }
 0x339   :  { %v535_v61 = vpop.f32.mrf.mxu0 }
 0x33a   :  { %v545_v62 = vmul.f32 %v1849_v60, %v535_v61  ;;  %1714 = vmatmul.mubr.msk.f32.gmra.mxu1 %vm187_vm2, %v2163_v56 }
 0x33b   :  { %v1689_v63 = vpop.f32.mrf.mxu0  ;;  %1716 = vmatprep.mubr.msk.f32.mxu1 %vm1911_vm0, %v1910_v0 }
 0x33c   :  { %v2169_v1 = vadd.f32 %v1485_v22, %v545_v62 }
 0x33e   :  { %1717 = vmatmul.mubr.msk.f32.gmra.mxu1 %vm187_vm2, %v2169_v1 }
 0x33f   :  { %1750 = vmatprep.mubr.msk.f32.mxu1 %vm1911_vm0, %v1910_v0 }
 0x3e6   :  { %v644_v3 = vpop.f32.mrf.mxu1 }
 0x3e7   :  { %v682_v4 = vmul.f32 %v1493_v2, %v644_v3 }
 0x3e8   :  { %v1700_v5 = vpop.f32.mrf.mxu1 }
 0x3e9   :  { %v689_v7 = vsel %vm187_vm2, %v682_v4, 0.0 }
 0x3ea   :  { %690 = vadd.xlane.f32.xlu1 %v689_v7  ;;  %v649_v8 = vpop.f32.mrf.mxu1 }
 0x3eb   :  { %v683_v9 = vmul.f32 %v1493_v2, %v649_v8 }
 0x3ec   :  { %v1703_v10 = vpop.f32.mrf.mxu1 }
 0x3ed   :  { %v692_v11 = vsel %vm187_vm2, %v683_v9, 0.0 }
 0x3ee   :  { %693 = vadd.xlane.f32.xlu0 %v692_v11  ;;  %v654_v12 = vpop.f32.mrf.mxu1 }
 0x3ef   :  { %v684_v13 = vmul.f32 %v1493_v2, %v654_v12 }
 0x3f0   :  { %v1706_v14 = vpop.f32.mrf.mxu1 }
 0x3f1   :  { %v695_v15 = vsel %vm187_vm2, %v684_v13, 0.0 }
 0x3f2   :  { %696 = vadd.xlane.f32.xlu1 %v695_v15  ;;  %v659_v16 = vpop.f32.mrf.mxu1 }
 0x3f3   :  { %v685_v18 = vmul.f32 %v1493_v2, %v659_v16 }
 0x3f4   :  { %v1709_v20 = vpop.f32.mrf.mxu1 }
 0x3f5   :  { %v698_v21 = vsel %vm187_vm2, %v685_v18, 0.0 }
 0x3f6   :  { %699 = vadd.xlane.f32.xlu0 %v698_v21  ;;  %v664_v22 = vpop.f32.mrf.mxu1 }
 0x3f7   :  { %v686_v23 = vmul.f32 %v1493_v2, %v664_v22 }
 0x3f8   :  { %v1712_v24 = vpop.f32.mrf.mxu1 }
 0x3f9   :  { %v701_v25 = vsel %vm187_vm2, %v686_v23, 0.0 }
 0x3fa   :  { %702 = vadd.xlane.f32.xlu1 %v701_v25  ;;  %v669_v28 = vpop.f32.mrf.mxu1 }
 0x3fb   :  { %v687_v29 = vmul.f32 %v1493_v2, %v669_v28 }
 0x3fc   :  { %v1715_v30 = vpop.f32.mrf.mxu1 }
 0x3fd   :  { %v704_v31 = vsel %vm187_vm2, %v687_v29, 0.0 }
 0x3fe   :  { %705 = vadd.xlane.f32.xlu0 %v704_v31  ;;  %v674_v32 = vpop.f32.mrf.mxu1 }
 0x3ff   :  { %1720 = vmatpush3.xpose.msk.msra.mxu0 %vm187_vm2, %v674_v32  ;;  %1737 = vmatpush3.msk.msra.mxu1 %vm436_vm3, %v674_v32  ;;  %v688_v34 = vmul.f32 %v1493_v2, %v674_v32 }
 0x400   :  { %v1718_v35 = vpop.f32.mrf.mxu1  ;;  %1738 = vmatprep.subr.mxu1 %v1910_v0  ;;  %1721 = vmatprep.subr.mxu0 %v1910_v0 }
 0x401   :  { %1739 = vmatpush3.msra.mxu1 %v669_v28  ;;  %v707_v36 = vsel %vm206_vm4, %v688_v34, 0.0 }
 0x402   :  { %1740 = vmatprep.subr.mxu1 %v1910_v0  ;;  %708 = vadd.xlane.f32.xlu1 %v707_v36 }
 0x403   :  { %1722 = vmatpush3.xpose.msk.msra.mxu0 %vm187_vm2, %v669_v28  ;;  %1741 = vmatpush3.msra.mxu1 %v664_v22 }
 0x404   :  { %1742 = vmatprep.subr.mxu1 %v1910_v0  ;;  %1723 = vmatprep.subr.mxu0 %v1910_v0 }
 0x405   :  { %1743 = vmatpush3.msra.mxu1 %v659_v16 }
 0x406   :  { %1744 = vmatprep.subr.mxu1 %v1910_v0 }
 0x407   :  { %1724 = vmatpush3.xpose.msk.msra.mxu0 %vm187_vm2, %v664_v22  ;;  %1745 = vmatpush3.msra.mxu1 %v654_v12 }
 0x408   :  { %1746 = vmatprep.subr.mxu1 %v1910_v0  ;;  %1725 = vmatprep.subr.mxu0 %v1910_v0 }
 0x409   :  { %1747 = vmatpush3.msra.mxu1 %v649_v8 }
 0x40a   :  { %1748 = vmatprep.subr.mxu1 %v1910_v0 }
 0x40b   :  { %1726 = vmatpush3.xpose.msk.msra.mxu0 %vm187_vm2, %v659_v16  ;;  %1749 = vmatpush3.msra.mxu1 %v644_v3 }
 0x40c   :  { %1727 = vmatprep.subr.mxu0 %v1910_v0 }
 0x40f   :  { %1728 = vmatpush3.xpose.msk.msra.mxu0 %vm187_vm2, %v654_v12 }
 0x410   :  { %1729 = vmatprep.subr.mxu0 %v1910_v0 }
 0x413   :  { %1730 = vmatpush3.xpose.msk.msra.mxu0 %vm187_vm2, %v649_v8 }
 0x414   :  { %1731 = vmatprep.subr.mxu0 %v1910_v0 }
 0x417   :  { %1732 = vmatpush3.xpose.msk.msra.mxu0 %vm187_vm2, %v644_v3 }
 0x418   :  { %1771 = vmatprep.subr.mxu0 %v1910_v0 }
 0x41a   :  { %1734 = vmatmul.mubr.msk.f32.vlgmr.msra.gmra.mxu0 %vm187_vm2, %v46_v37 }
 0x41b   :  { %1779 = vmatprep.mubr.msk.f32.mxu0 %vm1911_vm0, %v1910_v0 }
 0x473   :  { %v691_v38 = vpop.xlane.xlu1 %690 }
 0x477   :  { %v694_v40 = vpop.xlane.xlu0 %693 }
 0x47b   :  { %v697_v41 = vpop.xlane.xlu1 %696 }
 0x47f   :  { %v700_v42 = vpop.xlane.xlu0 %699 }
 0x483   :  { %v703_v44 = vpop.xlane.xlu1 %702 }
 0x487   :  { %v706_v50 = vpop.xlane.xlu0 %705 }
 0x48b   :  { %v709_v52 = vpop.xlane.xlu1 %708 }
 0x4da   :  { %v800_v47 = vpop.f32.mrf.mxu0 }
 0x4db   :  { %v807_v48 = vrot.slane %v800_v47, %v306_v45 }
 0x4dc   :  { %v1735_v49 = vpop.f32.mrf.mxu0 }
 0x4dd   :  { %v809_v53 = vadd.f32 %v807_v48, %v694_v40  ;;  %v808_v54 = vadd.f32 %v807_v48, %v691_v38  ;;  %v811_v55 = vadd.f32 %v807_v48, %v700_v42  ;;  %v810_v60 = vadd.f32 %v807_v48, %v697_v41 }
 0x4de   :  { %v813_v61 = vadd.f32 %v807_v48, %v706_v50  ;;  %v812_v62 = vadd.f32 %v807_v48, %v703_v44  ;;  %v814_v63 = vadd.f32 %v807_v48, %v709_v52 }
 0x4df   :  { %vm816_vm14 = vcmp.ge.f32.partialorder %v809_v53, 0.0  ;;  %v823_v2 = vmul.f32 0.2, %v809_v53  ;;  %vm815_vm15 = vcmp.ge.f32.partialorder %v808_v54, 0.0  ;;  %v822_v3 = vmul.f32 0.2, %v808_v54 }
 0x4e0   :  { %vm818_vm1 = vcmp.ge.f32.partialorder %v811_v55, 0.0  ;;  %v825_v4 = vmul.f32 0.2, %v811_v55  ;;  %vm817_vm6 = vcmp.ge.f32.partialorder %v810_v60, 0.0  ;;  %v824_v5 = vmul.f32 0.2, %v810_v60 }
 0x4e1   :  { %v830_v7 = vsel %vm816_vm14, %v809_v53, %v823_v2  ;;  %v829_v45 = vsel %vm815_vm15, %v808_v54, %v822_v3  ;;  %vm820_vm7 = vcmp.ge.f32.partialorder %v813_v61, 0.0  ;;  %v827_v8 = vmul.f32 0.2, %v813_v61 }
 0x4e2   :  { %v837_v9 = vadd.f32 %v830_v7, %v2040_v57  ;;  %v836_v10 = vadd.f32 %v829_v45, %v2045_v58  ;;  %v832_v11 = vsel %vm818_vm1, %v811_v55, %v825_v4  ;;  %v831_v12 = vsel %vm817_vm6, %v810_v60, %v824_v5 }
 0x4e3   :  { %v839_v13 = vadd.f32 %v832_v11, %v2050_v59  ;;  %vm819_vm8 = vcmp.ge.f32.partialorder %v812_v62, 0.0  ;;  %v838_v16 = vadd.f32 %v831_v12, %v2055_v6  ;;  %v826_v18 = vmul.f32 0.2, %v812_v62  ;;  %v50_v11 = vld [vmem:[%s2439_s2 + $0x70] sm:$0xff]  ;;  %v49_v12 = vld [vmem:[%s2439_s2 + $0x68] sm:$0xff] }
 0x4e4   :  { %v846_v14 = vsel %vm343_vm5, %v837_v9, -inf  ;;  %v843_v15 = vsel %vm343_vm5, %v836_v10, -inf  ;;  %v834_v20 = vsel %vm820_vm7, %v813_v61, %v827_v8  ;;  %v828_v21 = vmul.f32 0.2, %v814_v63 }
 0x4e5   :  { %847 = vmax.xlane.f32.xlu1 %v846_v14  ;;  %844 = vmax.xlane.f32.xlu0 %v843_v15  ;;  %v833_v22 = vsel %vm819_vm8, %v812_v62, %v826_v18  ;;  %vm821_vm9 = vcmp.ge.f32.partialorder %v814_v63, 0.0  ;;  %v852_v57 = vsel %vm343_vm5, %v839_v13, -inf  ;;  %v849_v58 = vsel %vm343_vm5, %v838_v16, -inf }
 0x4e6   :  { %v841_v59 = vadd.f32 %v834_v20, %v2066_v17  ;;  %v840_v23 = vadd.f32 %v833_v22, %v2071_v19  ;;  %v835_v24 = vsel %vm821_vm9, %v814_v63, %v828_v21 }
 0x4e7   :  { %v842_v28 = vadd.f32 %v835_v24, %v2080_v26 }
 0x4e8   :  { %v858_v6 = vsel %vm343_vm5, %v841_v59, -inf  ;;  %v855_v25 = vsel %vm343_vm5, %v840_v23, -inf }
 0x4e9   :  { %853 = vmax.xlane.f32.xlu1 %v852_v57  ;;  %850 = vmax.xlane.f32.xlu0 %v849_v58  ;;  %v861_v29 = vsel %vm362_vm13, %v842_v28, -inf }
 0x4ed   :  { %859 = vmax.xlane.f32.xlu1 %v858_v6  ;;  %856 = vmax.xlane.f32.xlu0 %v855_v25 }
 0x4f1   :  { %862 = vmax.xlane.f32.xlu0 %v861_v29 }
 0x56e   :  { %v845_v30 = vpop.xlane.xlu0 %844  ;;  %v848_v31 = vpop.xlane.xlu1 %847 }
 0x56f   :  { %v864_v32 = vsub.f32 %v836_v10, %v845_v30  ;;  %v865_v17 = vsub.f32 %v837_v9, %v848_v31  ;;  %v51_v10 = vld [vmem:[%s2439_s2 + $0x78] sm:$0xff] }
 0x570   :  { %1772 = vmatpush3.msra.mxu0 %v51_v10  ;;  %v1510_v30 = vld [vmem:[%s2439_s2 + $0x58] ss:$0 sm:$0xff] }
 0x571   :  { %v871_v34 = vmul.f32 1.442695, %v864_v32  ;;  %v873_v19 = vmul.f32 1.442695, %v865_v17  ;;  %1773 = vmatprep.subr.mxu0 %v1910_v0 }
 0x572   :  { %v851_v35 = vpop.xlane.xlu0 %850  ;;  %v854_v36 = vpop.xlane.xlu1 %853  ;;  %1774 = vmatpush3.msra.mxu0 %v50_v11 }
 0x573   :  { %1850 = vpow2.f32 %v871_v34  ;;  %v866_v37 = vsub.f32 %v838_v16, %v851_v35  ;;  %v867_v38 = vsub.f32 %v839_v13, %v854_v36  ;;  %1775 = vmatprep.subr.mxu0 %v1910_v0  ;;  %v48_v13 = vld [vmem:[%s2439_s2 + $0x60] sm:$0xff] }
 0x574   :  { %1852 = vpow2.f32 %v873_v19  ;;  %1776 = vmatpush3.msra.mxu0 %v49_v12 }
 0x575   :  { %v875_v40 = vmul.f32 1.442695, %v866_v37  ;;  %v877_v41 = vmul.f32 1.442695, %v867_v38  ;;  %1777 = vmatprep.subr.mxu0 %v1910_v0 }
 0x576   :  { %v857_v26 = vpop.xlane.xlu0 %856  ;;  %v860_v42 = vpop.xlane.xlu1 %859  ;;  %1778 = vmatpush3.msra.mxu0 %v48_v13 }
 0x577   :  { %1854 = vpow2.f32 %v875_v40  ;;  %v868_v44 = vsub.f32 %v840_v23, %v857_v26  ;;  %v869_v47 = vsub.f32 %v841_v59, %v860_v42  ;;  %1782 = vmatprep.subr.mxu0 %v1910_v0 }
 0x578   :  { %1856 = vpow2.f32 %v877_v41 }
 0x579   :  { %v879_v48 = vmul.f32 1.442695, %v868_v44  ;;  %v881_v49 = vmul.f32 1.442695, %v869_v47 }
 0x57a   :  { %v863_v50 = vpop.xlane.xlu0 %862 }
 0x57b   :  { %1858 = vpow2.f32 %v879_v48  ;;  %v870_v52 = vsub.f32 %v842_v28, %v863_v50 }
 0x57c   :  { %1860 = vpow2.f32 %v881_v49 }
 0x57d   :  { %v883_v53 = vmul.f32 1.442695, %v870_v52 }
 0x57f   :  { %1862 = vpow2.f32 %v883_v53 }
 0x580   :  { %v1851_v54 = vpop.eup %1850 }
 0x581   :  { %v1853_v55 = vpop.eup %1852  ;;  %1751 = vmatmul.mubr.msk.f32.vlgmr.msra.gmra.mxu1 %vm343_vm5, %v1851_v54  ;;  %v885_v60 = vsel %vm343_vm5, %v1851_v54, 0.0 }
 0x582   :  { %886 = vadd.xlane.f32.xlu1 %v885_v60  ;;  %v888_v61 = vsel %vm343_vm5, %v1853_v55, 0.0  ;;  %1753 = vmatprep.mubr.msk.f32.mxu1 %vm1911_vm0, %v1910_v0 }
 0x583   :  { %889 = vadd.xlane.f32.xlu0 %v888_v61 }
 0x584   :  { %v1855_v62 = vpop.eup %1854 }
 0x585   :  { %v1857_v63 = vpop.eup %1856  ;;  %1754 = vmatmul.mubr.msk.f32.gmra.mxu1 %vm343_vm5, %v1853_v55  ;;  %v891_v2 = vsel %vm343_vm5, %v1855_v62, 0.0 }
 0x586   :  { %892 = vadd.xlane.f32.xlu1 %v891_v2  ;;  %v894_v3 = vsel %vm343_vm5, %v1857_v63, 0.0  ;;  %1756 = vmatprep.mubr.msk.f32.mxu1 %vm1911_vm0, %v1910_v0 }
 0x587   :  { %895 = vadd.xlane.f32.xlu0 %v894_v3 }
 0x588   :  { %v1859_v4 = vpop.eup %1858 }
 0x589   :  { %v1861_v5 = vpop.eup %1860  ;;  %1757 = vmatmul.mubr.msk.f32.gmra.mxu1 %vm343_vm5, %v1855_v62  ;;  %v897_v7 = vsel %vm343_vm5, %v1859_v4, 0.0 }
 0x58a   :  { %898 = vadd.xlane.f32.xlu1 %v897_v7  ;;  %v900_v45 = vsel %vm343_vm5, %v1861_v5, 0.0  ;;  %1759 = vmatprep.mubr.msk.f32.mxu1 %vm1911_vm0, %v1910_v0 }
 0x58b   :  { %901 = vadd.xlane.f32.xlu0 %v900_v45 }
 0x58c   :  { %v1863_v8 = vpop.eup %1862 }
 0x58d   :  { %1760 = vmatmul.mubr.msk.f32.gmra.mxu1 %vm343_vm5, %v1857_v63  ;;  %v903_v9 = vsel %vm362_vm13, %v1863_v8, 0.0 }
 0x58e   :  { %904 = vadd.xlane.f32.xlu1 %v903_v9  ;;  %1762 = vmatprep.mubr.msk.f32.mxu1 %vm1911_vm0, %v1910_v0 }
 0x591   :  { %1763 = vmatmul.mubr.msk.f32.gmra.mxu1 %vm343_vm5, %v1859_v4 }
 0x592   :  { %1765 = vmatprep.mubr.msk.f32.mxu1 %vm1911_vm0, %v1910_v0 }
 0x595   :  { %1766 = vmatmul.mubr.msk.f32.gmra.mxu1 %vm343_vm5, %v1861_v5 }
 0x596   :  { %1768 = vmatprep.mubr.msk.f32.mxu1 %vm1911_vm0, %v1910_v0 }
 0x599   :  { %1769 = vmatmul.mubr.msk.f32.gmra.mxu1 %vm343_vm5, %v1863_v8 }
 0x60b   :  { %v887_v14 = vpop.xlane.xlu1 %886 }
 0x60c   :  { %v890_v15 = vpop.xlane.xlu0 %889 }
 0x60d   :  { %1864 = vrcp.f32 %v890_v15 }
 0x60e   :  { %1866 = vrcp.f32 %v887_v14 }
 0x60f   :  { %v893_v16 = vpop.xlane.xlu1 %892 }
 0x610   :  { %1868 = vrcp.f32 %v893_v16  ;;  %v896_v18 = vpop.xlane.xlu0 %895 }
 0x611   :  { %1870 = vrcp.f32 %v896_v18 }
 0x613   :  { %v899_v20 = vpop.xlane.xlu1 %898 }
 0x614   :  { %1872 = vrcp.f32 %v899_v20  ;;  %v902_v58 = vpop.xlane.xlu0 %901 }
 0x615   :  { %1874 = vrcp.f32 %v902_v58 }
 0x617   :  { %v905_v29 = vpop.xlane.xlu1 %904 }
 0x618   :  { %1876 = vrcp.f32 %v905_v29 }
 0x61a   :  { %v1865_v57 = vpop.eup %1864 }
 0x61b   :  { %v1867_v24 = vpop.eup %1866 }
 0x61d   :  { %v1869_v28 = vpop.eup %1868 }
 0x61e   :  { %v1871_v36 = vpop.eup %1870 }
 0x621   :  { %v1873_v47 = vpop.eup %1872 }
 0x622   :  { %v1875_v60 = vpop.eup %1874 }
 0x625   :  { %v1877_v7 = vpop.eup %1876 }
 0x641   :  { %v1002_v21 = vpop.f32.mrf.mxu1 }
 0x642   :  { %v1036_v25 = vmul.f32 %v1867_v24, %v1002_v21 }
 0x643   :  { %v1752_v22 = vpop.f32.mrf.mxu1 }
 0x644   :  { %v1047_v19 = vadd.f32 %v1510_v30, %v1036_v25 }
 0x645   :  { %v1007_v59 = vpop.f32.mrf.mxu1 }
 0x646   :  { %v1037_v23 = vmul.f32 %v1865_v57, %v1007_v59  ;;  %v1054_v26 = vadd.f32 %v1047_v19, %v2133_v27 }
 0x647   :  { %v1755_v6 = vpop.f32.mrf.mxu1 }
 0x648   :  { %v1048_v32 = vadd.f32 %v1510_v30, %v1037_v23  ;;  %v2279_v54 = vmax.f32 %v1054_v26, 0.0 }
 0x649   :  { %v1012_v31 = vpop.f32.mrf.mxu1 }
 0x64a   :  { %v1038_v17 = vmul.f32 %v1869_v28, %v1012_v31  ;;  %v1055_v38 = vadd.f32 %v1048_v32, %v2139_v33  ;;  %v1088_v24 = vsel %vm187_vm2, %v2279_v54, -inf }
 0x64b   :  { %v1758_v34 = vpop.f32.mrf.mxu1 }
 0x64c   :  { %v1049_v35 = vadd.f32 %v1510_v30, %v1038_v17  ;;  %v2276_v49 = vmax.f32 %v1055_v38, 0.0 }
 0x64d   :  { %v1017_v37 = vpop.f32.mrf.mxu1 }
 0x64e   :  { %v1039_v40 = vmul.f32 %v1871_v36, %v1017_v37  ;;  %v1056_v42 = vadd.f32 %v1049_v35, %v2145_v39  ;;  %v1069_v27 = vsel %vm187_vm2, %v2276_v49, 0.0  ;;  %v1089_v57 = vsel %vm187_vm2, %v2276_v49, -inf }
 0x64f   :  { %v1761_v41 = vpop.f32.mrf.mxu1 }
 0x650   :  { %v1050_v44 = vadd.f32 %v1510_v30, %v1039_v40  ;;  %v2281_v55 = vmax.f32 %v1056_v42, 0.0 }
 0x651   :  { %v1022_v48 = vpop.f32.mrf.mxu1 }
 0x652   :  { %v1057_v50 = vadd.f32 %v1050_v44, %v2151_v46  ;;  %v1040_v52 = vmul.f32 %v1873_v47, %v1022_v48  ;;  %v1068_v46 = vsel %vm187_vm2, %v2279_v54, 0.0  ;;  %v1071_v3 = vsel %vm187_vm2, %v2281_v55, 0.0 }
 0x653   :  { %v1764_v53 = vpop.f32.mrf.mxu1  ;;  %v1070_v45 = vadd.f32 %v1069_v27, %v1068_v46  ;;  %v1090_v6 = vsel %vm187_vm2, %v2281_v55, -inf }
 0x654   :  { %v1051_v33 = vadd.f32 %v1510_v30, %v1040_v52  ;;  %v2285_v39 = vmax.f32 %v1057_v50, 0.0  ;;  %v1511_v53 = vld [vmem:[%s2439_s2 + $0x80] ss:$0 sm:$0xff] }
 0x655   :  { %v1027_v61 = vpop.f32.mrf.mxu1  ;;  %v1072_v11 = vadd.f32 %v1071_v3, %v1070_v45 }
 0x656   :  { %v1058_v62 = vadd.f32 %v1051_v33, %v2157_v51  ;;  %v1041_v63 = vmul.f32 %v1875_v60, %v1027_v61  ;;  %v1073_v9 = vsel %vm187_vm2, %v2285_v39, 0.0  ;;  %v1091_v31 = vsel %vm187_vm2, %v2285_v39, -inf }
 0x657   :  { %v1767_v2 = vpop.f32.mrf.mxu1  ;;  %v1074_v16 = vadd.f32 %v1073_v9, %v1072_v11 }
 0x658   :  { %v2292_v4 = vmax.f32 %v1058_v62, 0.0  ;;  %v1052_v5 = vadd.f32 %v1510_v30, %v1041_v63 }
 0x659   :  { %v1032_v8 = vpop.f32.mrf.mxu1 }
 0x65a   :  { %v1059_v10 = vadd.f32 %v1052_v5, %v2163_v56  ;;  %v1042_v51 = vmul.f32 %v1877_v7, %v1032_v8  ;;  %v1075_v13 = vsel %vm187_vm2, %v2292_v4, 0.0  ;;  %v1092_v56 = vsel %vm187_vm2, %v2292_v4, -inf }
 0x65b   :  { %v1770_v12 = vpop.f32.mrf.mxu1  ;;  %v1076_v22 = vadd.f32 %v1075_v13, %v1074_v16  ;;  %v1093_v28 = vmax.f32 %v1088_v24, %v1092_v56  ;;  %v1455_v24 = vld [vmem:[%s2441_s0 + $0x40] sm:$0xff] }
 0x65c   :  { %v1066_v14 = vmax.f32 %v1059_v10, 0.0  ;;  %v1053_v15 = vadd.f32 %v1510_v30, %v1042_v51 }
 0x65e   :  { %v1077_v18 = vsel %vm187_vm2, %v1066_v14, 0.0  ;;  %v1094_v20 = vsel %vm187_vm2, %v1066_v14, -inf  ;;  %v1060_v21 = vadd.f32 %v1053_v15, %v2169_v1 }
 0x65f   :  { %v1078_v59 = vadd.f32 %v1077_v18, %v1076_v22  ;;  %v1095_v23 = vmax.f32 %v1089_v57, %v1094_v20 }
 0x660   :  { %v1067_v58 = vmax.f32 %v1060_v21, 0.0 }
 0x661   :  { %v1098_v32 = vmax.f32 %v1093_v28, %v1095_v23  ;;  %v1459_v28 = vld [vmem:[%s2441_s0 + $0x60] sm:$0xff] }
 0x662   :  { %v1079_v25 = vsel %vm206_vm4, %v1067_v58, 0.0  ;;  %v1096_v1 = vsel %vm206_vm4, %v1067_v58, -inf }
 0x663   :  { %v1080_v29 = vadd.f32 %v1079_v25, %v1078_v59  ;;  %v1097_v30 = vmax.f32 %v1090_v6, %v1096_v1  ;;  %v1454_v59 = vld [vmem:[%s2441_s0 + $0x38] sm:$0xff]  ;;  %v1456_v6 = vld [vmem:[%s2441_s0 + $0x48] sm:$0xff]  ;;  %v1457_v25 = vld [vmem:[%s2441_s0 + $0x50] sm:$0xff] }
 0x664   :  { %v1458_v1 = vld [vmem:[%s2441_s0 + $0x58] sm:$0xff] }
 0x665   :  { %v1081_v17 = vrot.slane %v1080_v29, 4  ;;  %v1099_v34 = vmax.f32 %v1097_v30, %v1091_v31  ;;  %v1912_v30 = vmov 0   ;;  %v1514_v31 = vld [vmem:[%s2439_s2 + $0x88] ss:$0 sm:$0xff] }
 0x666   :  { %1820 = vset.pattern.permute.xlu1 %v1912_v30  ;;  %1821 = vset.pattern.permute.xlu0 %v1912_v30 }
 0x667   :  { %v1082_v19 = vadd.f32 %v1081_v17, %v1080_v29  ;;  %v1100_v35 = vmax.f32 %v1098_v32, %v1099_v34  ;;  %v1460_v29 = vld [vmem:[%s2441_s0 + $0x68] sm:$0xf] }
 0x669   :  { %v1083_v36 = vrot.slane %v1082_v19, 2  ;;  %v1101_v37 = vrot.slane %v1100_v35, 4 }
 0x66b   :  { %v1084_v38 = vadd.f32 %v1083_v36, %v1082_v19  ;;  %v1102_v40 = vmax.f32 %v1100_v35, %v1101_v37 }
 0x66d   :  { %v1085_v41 = vrot.slane %v1084_v38, 1  ;;  %v1103_v26 = vrot.slane %v1102_v40, 2 }
 0x66f   :  { %v1086_v42 = vadd.f32 %v1085_v41, %v1084_v38  ;;  %v1104_v44 = vmax.f32 %v1102_v40, %v1103_v26 }
 0x671   :  { %v1105_v47 = vrot.slane %v1104_v44, 1  ;;  %v1087_v48 = vmul.f32 0.01923077, %v1086_v42 }
 0x673   :  { %v1106_v50 = vmax.f32 %v1104_v44, %v1105_v47 }
 0x675   :  { %v1110_v52 = vsel %vm1109_vm10, %v1087_v48, %v1106_v50 }
 0x676   :  { %1780 = vmatmul.mubr.msk.f32.vlgmr.msra.gmra.mxu0 %vm187_vm2, %v1110_v52 }
 0x677   :  { %1796 = vmatprep.mubr.msk.f32.mxu0 %vm1911_vm0, %v1910_v0 }
 0x736   :  { %v1184_v33 = vpop.f32.mrf.mxu0 }
 0x737   :  { %v1185_v60 = vadd.f32 %v1511_v53, %v1184_v33 }
 0x738   :  { %v1781_v61 = vpop.f32.mrf.mxu0 }
 0x739   :  { %v1188_v27 = vmax.f32 %v1185_v60, 0.0 }
 0x73b   :  { %v1190_v62 = vsel %vm1189_vm11, %v1188_v27, 0.0 }
 0x73c   :  { %v1191_v63 = vrot.slane %v1190_v62, 4 }
 0x73e   :  { %v1192_v43 = vadd.f32 %v1191_v63, %v1190_v62 }
 0x740   :  { %v1193_v2 = vrot.slane %v1192_v43, 2 }
 0x742   :  { %v1194_v46 = vadd.f32 %v1193_v2, %v1192_v43 }
 0x744   :  { %v1195_v3 = vrot.slane %v1194_v46, 1 }
 0x746   :  { %v1196_v5 = vadd.f32 %v1195_v3, %v1194_v46 }
 0x748   :  { %v1513_v7 = vmul.f32 -1.442695, %v1196_v5 }
 0x74a   :  { %1878 = vpow2.f32 %v1513_v7 }
 0x757   :  { %v1879_v45 = vpop.eup %1878 }
 0x758   :  { %v1200_v8 = vadd.f32 1.0, %v1879_v45 }
 0x75a   :  { %1880 = vrcp.f32 %v1200_v8 }
 0x767   :  { %v1881_v9 = vpop.eup %1880 }
 0x768   :  { %v2321_v10 = vmul.f32 %v1881_v9, %v1067_v58  ;;  %v2323_v51 = vmul.f32 %v1881_v9, %v1066_v14  ;;  %v2330_v13 = vmul.f32 %v1881_v9, %v2292_v4  ;;  %v2333_v15 = vmul.f32 %v1881_v9, %v2285_v39 }
 0x769   :  { %v2340_v18 = vmul.f32 %v1881_v9, %v2281_v55  ;;  %v2343_v20 = vmul.f32 %v1881_v9, %v2276_v49  ;;  %v2350_v21 = vmul.f32 %v1881_v9, %v2279_v54 }
 0x76a   :  { %v1228_v11 = vsel %vm206_vm4, %v2321_v10, -inf  ;;  %v1225_v12 = vsel %vm187_vm2, %v2323_v51, -inf  ;;  %v1222_v16 = vsel %vm187_vm2, %v2330_v13, -inf  ;;  %v1219_v14 = vsel %vm187_vm2, %v2333_v15, -inf }
 0x76b   :  { %1229 = vmax.xlane.f32.xlu0 %v1228_v11  ;;  %1226 = vmax.xlane.f32.xlu1 %v1225_v12  ;;  %v1216_v39 = vsel %vm187_vm2, %v2340_v18, -inf  ;;  %v1213_v4 = vsel %vm187_vm2, %v2343_v20, -inf  ;;  %v1210_v55 = vsel %vm187_vm2, %v2350_v21, -inf }
 0x76f   :  { %1223 = vmax.xlane.f32.xlu0 %v1222_v16  ;;  %1220 = vmax.xlane.f32.xlu1 %v1219_v14 }
 0x773   :  { %1217 = vmax.xlane.f32.xlu0 %v1216_v39  ;;  %1214 = vmax.xlane.f32.xlu1 %v1213_v4 }
 0x777   :  { %1211 = vmax.xlane.f32.xlu0 %v1210_v55 }
 0x7f4   :  { %v1230_v22 = vpop.xlane.xlu0 %1229  ;;  %v1227_v49 = vpop.xlane.xlu1 %1226 }
 0x7f5   :  { %1783 = vmatpush3.msk.msra.mxu0 %vm436_vm3, %v1230_v22 }
 0x7f6   :  { %1784 = vmatprep.subr.mxu0 %v1910_v0 }
 0x7f7   :  { %1785 = vmatpush3.msra.mxu0 %v1227_v49 }
 0x7f8   :  { %1786 = vmatprep.subr.mxu0 %v1910_v0  ;;  %v1224_v57 = vpop.xlane.xlu0 %1223  ;;  %v1221_v56 = vpop.xlane.xlu1 %1220 }
 0x7f9   :  { %1787 = vmatpush3.msra.mxu0 %v1224_v57 }
 0x7fa   :  { %1788 = vmatprep.subr.mxu0 %v1910_v0 }
 0x7fb   :  { %1789 = vmatpush3.msra.mxu0 %v1221_v56 }
 0x7fc   :  { %1790 = vmatprep.subr.mxu0 %v1910_v0  ;;  %v1218_v54 = vpop.xlane.xlu0 %1217  ;;  %v1215_v58 = vpop.xlane.xlu1 %1214 }
 0x7fd   :  { %1791 = vmatpush3.msra.mxu0 %v1218_v54 }
 0x7fe   :  { %1792 = vmatprep.subr.mxu0 %v1910_v0 }
 0x7ff   :  { %1793 = vmatpush3.msra.mxu0 %v1215_v58 }
 0x800   :  { %1794 = vmatprep.subr.mxu0 %v1910_v0  ;;  %v1212_v23 = vpop.xlane.xlu0 %1211 }
 0x801   :  { %1795 = vmatpush3.msra.mxu0 %v1212_v23 }
 0x802   :  { %1797 = vmatmul.mubr.msk.f32.vlgmr.msra.gmra.mxu0 %vm343_vm5, %v1454_v59 }
 0x803   :  { %1799 = vmatprep.mubr.msk.f32.mxu0 %vm1911_vm0, %v1910_v0 }
 0x806   :  { %1800 = vmatmul.mubr.msk.f32.gmra.mxu0 %vm343_vm5, %v1455_v24 }
 0x807   :  { %1802 = vmatprep.mubr.msk.f32.mxu0 %vm1911_vm0, %v1910_v0 }
 0x80a   :  { %1803 = vmatmul.mubr.msk.f32.gmra.mxu0 %vm343_vm5, %v1456_v6 }
 0x80b   :  { %1805 = vmatprep.mubr.msk.f32.mxu0 %vm1911_vm0, %v1910_v0 }
 0x80e   :  { %1806 = vmatmul.mubr.msk.f32.gmra.mxu0 %vm343_vm5, %v1457_v25 }
 0x80f   :  { %1808 = vmatprep.mubr.msk.f32.mxu0 %vm1911_vm0, %v1910_v0 }
 0x812   :  { %1809 = vmatmul.mubr.msk.f32.gmra.mxu0 %vm343_vm5, %v1458_v1 }
 0x813   :  { %1811 = vmatprep.mubr.msk.f32.mxu0 %vm1911_vm0, %v1910_v0 }
 0x816   :  { %1812 = vmatmul.mubr.msk.f32.gmra.mxu0 %vm343_vm5, %v1459_v28 }
 0x817   :  { %1814 = vmatprep.mubr.msk.f32.mxu0 %vm1911_vm0, %v1910_v0 }
 0x81a   :  { %1815 = vmatmul.mubr.msk.f32.gmra.mxu0 %vm343_vm5, %v1460_v29 }
 0x8c2   :  { %v1325_v32 = vpop.f32.mrf.mxu0 }
 0x8c3   :  { %v1326_v17 = vadd.f32 %v1514_v31, %v1325_v32 }
 0x8c4   :  { %v1798_v34 = vpop.f32.mrf.mxu0 }
 0x8c5   :  { %v1523_v19 = vmul.f32 -1.442695, %v1326_v17 }
 0x8c6   :  { %v1330_v35 = vpop.f32.mrf.mxu0 }
 0x8c7   :  { %1882 = vpow2.f32 %v1523_v19  ;;  %v1331_v0 = vadd.f32 %v1514_v31, %v1330_v35 }
 0x8c8   :  { %v1801_v36 = vpop.f32.mrf.mxu0 }
 0x8c9   :  { %v1524_v37 = vmul.f32 -1.442695, %v1331_v0 }
 0x8ca   :  { %v1335_v38 = vpop.f32.mrf.mxu0 }
 0x8cb   :  { %1884 = vpow2.f32 %v1524_v37  ;;  %v1336_v40 = vadd.f32 %v1514_v31, %v1335_v38 }
 0x8cc   :  { %v1804_v41 = vpop.f32.mrf.mxu0 }
 0x8cd   :  { %v1525_v26 = vmul.f32 -1.442695, %v1336_v40 }
 0x8ce   :  { %v1340_v42 = vpop.f32.mrf.mxu0 }
 0x8cf   :  { %1886 = vpow2.f32 %v1525_v26  ;;  %v1341_v44 = vadd.f32 %v1514_v31, %v1340_v42 }
 0x8d0   :  { %v1807_v47 = vpop.f32.mrf.mxu0 }
 0x8d1   :  { %v1526_v48 = vmul.f32 -1.442695, %v1341_v44 }
 0x8d2   :  { %v1345_v50 = vpop.f32.mrf.mxu0 }
 0x8d3   :  { %1888 = vpow2.f32 %v1526_v48  ;;  %v1346_v52 = vadd.f32 %v1514_v31, %v1345_v50 }
 0x8d4   :  { %v1883_v53 = vpop.eup %1882  ;;  %v1810_v33 = vpop.f32.mrf.mxu0 }
 0x8d5   :  { %v1380_v60 = vadd.f32 1.0, %v1883_v53  ;;  %v1527_v61 = vmul.f32 -1.442695, %v1346_v52 }
 0x8d6   :  { %v1350_v27 = vpop.f32.mrf.mxu0 }
 0x8d7   :  { %1890 = vrcp.f32 %v1380_v60  ;;  %v1351_v62 = vadd.f32 %v1514_v31, %v1350_v27 }
 0x8d8   :  { %v1885_v63 = vpop.eup %1884  ;;  %1892 = vpow2.f32 %v1527_v61  ;;  %v1813_v43 = vpop.f32.mrf.mxu0 }
 0x8d9   :  { %v1381_v2 = vadd.f32 1.0, %v1885_v63  ;;  %v1528_v46 = vmul.f32 -1.442695, %v1351_v62 }
 0x8da   :  { %v1355_v3 = vpop.f32.mrf.mxu0 }
 0x8db   :  { %1894 = vrcp.f32 %v1381_v2  ;;  %v1356_v5 = vadd.f32 %v1514_v31, %v1355_v3 }
 0x8dc   :  { %v1887_v7 = vpop.eup %1886  ;;  %1896 = vpow2.f32 %v1528_v46  ;;  %v1816_v45 = vpop.f32.mrf.mxu0 }
 0x8dd   :  { %v1382_v8 = vadd.f32 1.0, %v1887_v7  ;;  %v1529_v9 = vmul.f32 -1.442695, %v1356_v5 }
 0x8df   :  { %1898 = vrcp.f32 %v1382_v8 }
 0x8e0   :  { %v1889_v11 = vpop.eup %1888  ;;  %1900 = vpow2.f32 %v1529_v9 }
 0x8e1   :  { %v1383_v12 = vadd.f32 1.0, %v1889_v11 }
 0x8e3   :  { %1902 = vrcp.f32 %v1383_v12 }
 0x8e4   :  { %v1891_v16 = vpop.eup %1890 }
 0x8e5   :  { %v1893_v14 = vpop.eup %1892  ;;  %1403 = vperm.xlu1 %1820, %v1891_v16  }
 0x8e6   :  { %v1384_v39 = vadd.f32 1.0, %v1893_v14 }
 0x8e8   :  { %v1895_v4 = vpop.eup %1894  ;;  %1904 = vrcp.f32 %v1384_v39 }
 0x8e9   :  { %v1897_v55 = vpop.eup %1896  ;;  %1408 = vperm.xlu0 %1821, %v1895_v4  }
 0x8ea   :  { %v1385_v22 = vadd.f32 1.0, %v1897_v55 }
 0x8ec   :  { %v1899_v49 = vpop.eup %1898  ;;  %1906 = vrcp.f32 %v1385_v22 }
 0x8ed   :  { %v1901_v57 = vpop.eup %1900  ;;  %1413 = vperm.xlu1 %1820, %v1899_v49  }
 0x8ee   :  { %v1386_v56 = vadd.f32 1.0, %v1901_v57 }
 0x8f0   :  { %v1903_v54 = vpop.eup %1902  ;;  %1908 = vrcp.f32 %v1386_v56 }
 0x8f1   :  { %1418 = vperm.xlu1 %1820, %v1903_v54  }
 0x8f5   :  { %v1905_v58 = vpop.eup %1904 }
 0x8f6   :  { %1423 = vperm.xlu1 %1820, %v1905_v58  }
 0x8f9   :  { %v1907_v59 = vpop.eup %1906 }
 0x8fa   :  { %1428 = vperm.xlu1 %1820, %v1907_v59  }
 0x8fd   :  { %v1909_v23 = vpop.eup %1908 }
 0x8fe   :  { %1433 = vperm.xlu1 %1820, %v1909_v23  }
 0x960   :  { %v1404_v24 = vpop.permute.xlu1 %1403 }
 0x961   :  { %v1436_v6 = vmul.f32 %v1404_v24, %v2350_v21 }
 0x963   :  { %1443 = vst.msk [vmem:[%s2442_s3] sm:$0xff] %vm187_vm2, %v1436_v6 }
 0x964   :  { %v1409_v25 = vpop.permute.xlu0 %1408 }
 0x965   :  { %v1437_v1 = vmul.f32 %v1409_v25, %v2343_v20 }
 0x967   :  { %1444 = vst.msk [vmem:[%s2442_s3 + $0x8] sm:$0xff] %vm187_vm2, %v1437_v1 }
 0x968   :  { %v1414_v28 = vpop.permute.xlu1 %1413 }
 0x969   :  { %v1438_v29 = vmul.f32 %v1414_v28, %v2340_v18 }
 0x96b   :  { %1445 = vst.msk [vmem:[%s2442_s3 + $0x10] sm:$0xff] %vm187_vm2, %v1438_v29 }
 0x96c   :  { %v1419_v21 = vpop.permute.xlu1 %1418 }
 0x96d   :  { %v1439_v30 = vmul.f32 %v1419_v21, %v2333_v15 }
 0x96f   :  { %1446 = vst.msk [vmem:[%s2442_s3 + $0x18] sm:$0xff] %vm187_vm2, %v1439_v30 }
 0x971   :  { %v1424_v20 = vpop.permute.xlu1 %1423 }
 0x972   :  { %v1440_v31 = vmul.f32 %v1424_v20, %v2330_v13 }
 0x974   :  { %1447 = vst.msk [vmem:[%s2442_s3 + $0x20] sm:$0xff] %vm187_vm2, %v1440_v31 }
 0x975   :  { %v1429_v18 = vpop.permute.xlu1 %1428 }
 0x976   :  { %v1441_v32 = vmul.f32 %v1429_v18, %v2323_v51 }
 0x978   :  { %1448 = vst.msk [vmem:[%s2442_s3 + $0x28] sm:$0xff] %vm187_vm2, %v1441_v32 }
 0x979   :  { %v1434_v15 = vpop.permute.xlu1 %1433 }
 0x97a   :  { %v1442_v17 = vmul.f32 %v1434_v15, %v2321_v10 }
 0x97c   :  { %1449 = vst.msk [vmem:[%s2442_s3 + $0x30] sm:$0xf] %vm206_vm4, %v1442_v17 }

</bundles_post_ra>
